<compile_context>
chip_gen: v7x
topology: tpu7x:2x2x1
jax: 0.10.0
libtpu: 0.0.40
codegen_flags: <defaults>
</compile_context>

<pallas_src>
import functools
import math

import jax
import jax.numpy as jnp
from jax.experimental import pallas as pl
from jax.experimental.pallas import tpu as pltpu

LN_EPS = 1e-5  # PyTorch nn.LayerNorm default


# ----------------------------------------------------------------------------
# In-kernel helpers
# ----------------------------------------------------------------------------
def _dot(a, b):
    return jnp.dot(a, b, preferred_element_type=jnp.float32)


def _layernorm(y, gamma, beta):
    mu = jnp.mean(y, axis=-1, keepdims=True)
    var = jnp.mean((y - mu) ** 2, axis=-1, keepdims=True)
    return (y - mu) * jax.lax.rsqrt(var + LN_EPS) * gamma + beta


# ----------------------------------------------------------------------------
# Single fused kernel: stem (step 0) + Berry layer per step + tail (last step)
# ----------------------------------------------------------------------------
def _fused_kernel(
    # node data + stem weights (constant index_map -> DMA'd once, stay resident)
    x_ref, kpos_ref, lab_ref, sym_ref,
    w_in_ref, w_k1_ref, w_k2_ref, sv_ref,
    # layer-invariant graph structure
    kdiff_ref, gath_ref, pool_ref,
    # per-layer stacked weights (streamed one layer per grid step)
    wbig_ref, lvec_ref, we1_ref, be1_ref,
    # tail weights
    watt_ref, batt_ref,
    hw1_ref, hv1_ref, hw2_ref, hb2_ref, hw3_ref, hb3_ref,
    woa_ref, wot_ref, ov_ref,
    # output + scratch
    o_ref, h_ref,
    *, n_edges, hidden, has_sym):

    H = hidden
    E = n_edges
    step = pl.program_id(0)

    # ----- stem: input_proj + ReLU, BrillouinZoneEncoder, residual add ---------
    @pl.when(step == 0)
    def _stem():
        sv = sv_ref[...]                               # [5,H]: b_in,b_k1,g_k1,be_k1,b_k2
        h0 = jnp.maximum(_dot(x_ref[...], w_in_ref[...]) + sv[0:1], 0.0)
        kp = kpos_ref[...]                             # [N, 3]
        wk1 = w_k1_ref[...]                            # [3, H]
        # K=3 contraction on the VPU (three broadcast FMAs), not the MXU.
        k1 = (kp[:, 0:1] * wk1[0:1] + kp[:, 1:2] * wk1[1:2]
              + kp[:, 2:3] * wk1[2:3] + sv[1:2])
        k1 = jnp.maximum(_layernorm(k1, sv[2:3], sv[3:4]), 0.0)
        k_emb = _dot(k1, w_k2_ref[...]) + sv[4:5]
        if has_sym:
            # Embedding lookup as a one-hot matmul (table is 10 x H).
            labels = lab_ref[...]                      # [N, 1] int32
            n_sym = sym_ref.shape[0]
            iota = jax.lax.broadcasted_iota(jnp.int32, (labels.shape[0], n_sym), 1)
            onehot = (labels == iota).astype(jnp.float32)
            k_emb = k_emb + _dot(onehot, sym_ref[...])
        h_ref[...] = h0 + k_emb

    # ----- BerryCurvatureLayer `step` + post LayerNorm --------------------------
    h = h_ref[...]                                     # [N, H]
    g = gath_ref[...]                                  # [2E, N]: dst rows | src rows
    xij = _dot(g, h)                                   # one MXU pass for both gathers
    x_i = xij[:E]                                      # [E, H]  (target nodes)
    x_j = xij[E:]                                      # [E, H]  (source nodes)
    kd = kdiff_ref[...]                                # [E, 3]  (layer invariant)

    Wb = wbig_ref[0]                                   # [5H + H//2, H]
    vec = lvec_ref[0]                                  # [13, H]
    w_mi = Wb[0:H]
    w_mj = Wb[H:2 * H]
    w_m2 = Wb[2 * H:3 * H]
    w_cb = Wb[3 * H:4 * H]
    w_ce = Wb[4 * H:5 * H]
    w_e2 = Wb[5 * H:5 * H + H // 2]

    # berry_connection_net: Linear(2H+3,H) with the concat removed (K-split dots,
    # k_diff part on the VPU), then LayerNorm -> ReLU -> Linear(H,H).
    m = _dot(x_i, w_mi) + _dot(x_j, w_mj)
    m = m + kd[:, 0:1] * vec[0:1] + kd[:, 1:2] * vec[1:2] + kd[:, 2:3] * vec[2:3]
    m = m + vec[3:4]
    m = jnp.maximum(_layernorm(m, vec[4:5], vec[5:6]), 0.0)
    msg = _dot(m, w_m2) + vec[6:7]                     # [E, H]

    # aggr='add' scatter to target nodes: gath_dst^T @ msg as a transposed MXU
    # contraction (no explicit [N, E] scatter matrix materialized / DMA'd).
    berry = jax.lax.dot_general(g[:E], msg, (((0,), (0,)), ((), ())),
                                preferred_element_type=jnp.float32)   # [N, H]

    # energy_gap_net: Linear(H, H/2) -> ReLU -> Linear(H/2, H)
    e1 = jnp.maximum(_dot(h, we1_ref[0]) + be1_ref[0], 0.0)           # [N, H//2]
    energy = _dot(e1, w_e2) + vec[7:8]                                # [N, H]

    # combine_net (concat removed) -> LayerNorm -> ReLU, residual, post LayerNorm
    out = _dot(berry, w_cb) + _dot(energy, w_ce) + vec[8:9]
    out = jnp.maximum(_layernorm(out, vec[9:10], vec[10:11]), 0.0)
    h_new = _layernorm(out + h, vec[11:12], vec[12:13])
    h_ref[...] = h_new

    # ----- tail: mean pool + topo heads + folded attention + output_proj --------
    @pl.when(step == pl.num_programs(0) - 1)
    def _tail():
        gf = _dot(pool_ref[...], h_new)                # [B, H] global mean pool
        # MultiheadAttention over a length-1 sequence: softmax of one score == 1,
        # so attended = out_proj(v_proj(gf)); Wv@Wo and biases folded offline.
        attended = _dot(gf, watt_ref[...]) + batt_ref[...]
        y = _dot(attended, woa_ref[...])               # [B, O]
        for i in range(3):                             # chern / z2 / mirror heads
            v1 = hv1_ref[i]                            # [3, th]: b1, ln_gamma, ln_beta
            t1 = _dot(gf, hw1_ref[i]) + v1[0:1]
            t1 = jnp.maximum(_layernorm(t1, v1[1:2], v1[2:3]), 0.0)
            t2 = jnp.maximum(_dot(t1, hw2_ref[i]) + hb2_ref[i], 0.0)
            ho = _dot(t2, hw3_ref[i]) + hb3_ref[i]     # [B, 4] (zero padded)
            y = y + _dot(ho, wot_ref[i])               # pad rows of wot are zero
        ov = ov_ref[...]                               # [3, O]: b_op, ln_gamma, ln_beta
        y = y + ov[0:1]
        # NOTE: O < 128 lowers to masked partial stores; pad O to 128 for real sizes.
        o_ref[...] = jnp.maximum(_layernorm(y, ov[1:2], ov[2:3]), 0.0)


# ----------------------------------------------------------------------------
# Deterministic parameter construction (mirrors the PyTorch module layout)
# ----------------------------------------------------------------------------
def _init_linear(key, fan_in, fan_out):
    k1, k2 = jax.random.split(key)
    lim = 1.0 / math.sqrt(fan_in)
    w = jax.random.uniform(k1, (fan_in, fan_out), jnp.float32, -lim, lim)
    b = jax.random.uniform(k2, (fan_out,), jnp.float32, -lim, lim)
    return w, b


def _init_ln(dim):
    return jnp.ones((dim,), jnp.float32), jnp.zeros((dim,), jnp.float32)


def make_params(key, node_feature_dim, hidden_dim, num_layers, output_dim):
    H = hidden_dim
    keys = iter(jax.random.split(key, 128))
    p = {}

    p["input_proj"] = _init_linear(next(keys), node_feature_dim, H)

    # BrillouinZoneEncoder
    p["bz"] = {
        "l1": _init_linear(next(keys), 3, H),
        "ln1": _init_ln(H),
        "l2": _init_linear(next(keys), H, H),
        "sym_emb": 0.02 * jax.random.normal(next(keys), (10, H), jnp.float32),
    }

    # BerryCurvatureLayer x num_layers (+ post LayerNorms)
    p["berry"], p["post_ln"] = [], []
    for _ in range(num_layers):
        p["berry"].append({
            "bc_l1": _init_linear(next(keys), 2 * H + 3, H),
            "bc_ln": _init_ln(H),
            "bc_l2": _init_linear(next(keys), H, H),
            "eg_l1": _init_linear(next(keys), H, H // 2),
            "eg_l2": _init_linear(next(keys), H // 2, H),
            "cmb_l": _init_linear(next(keys), 2 * H, H),
            "cmb_ln": _init_ln(H),
        })
        p["post_ln"].append(_init_ln(H))

    # TopologicalInvariantExtractor(input_dim=H, hidden_dim=H//2)
    th = H // 2

    def extractor(out_dim):
        return {
            "l1": _init_linear(next(keys), H, th),
            "ln": _init_ln(th),
            "l2": _init_linear(next(keys), th, th // 2),
            "l3": _init_linear(next(keys), th // 2, out_dim),
        }

    p["topo"] = {"chern": extractor(1), "z2": extractor(4), "mirror": extractor(2)}

    # MultiheadAttention: for seq_len == 1 only V- and out-projections matter.
    p["attn"] = {
        "wv": _init_linear(next(keys), H, H)[0],
        "bv": _init_linear(next(keys), H, H)[1],
        "wo": _init_linear(next(keys), H, H)[0],
        "bo": _init_linear(next(keys), H, H)[1],
    }

    # output_proj: Linear(H+7, output_dim) -> LayerNorm -> ReLU -> Dropout(eval)
    p["out_proj"] = {
        "l": _init_linear(next(keys), H + 7, output_dim),
        "ln": _init_ln(output_dim),
    }
    return p


def fuse_params(p):
    """Pre-split / pre-fold / stack parameters into the fused-kernel layout."""
    H = p["input_proj"][0].shape[1]
    r = lambda v: v.reshape(1, -1)

    # ----- stem --------------------------------------------------------------
    w_in, b_in = p["input_proj"]
    w_k1, b_k1 = p["bz"]["l1"]
    g_k1, be_k1 = p["bz"]["ln1"]
    w_k2, b_k2 = p["bz"]["l2"]
    stem_vecs = jnp.stack([b_in, b_k1, g_k1, be_k1, b_k2], axis=0)        # [5, H]
    stem = (w_in, w_k1, w_k2, stem_vecs)

    # ----- Berry layers: stack into 4 leading-axis arrays ---------------------
    Wbig_l, vec_l, we1_l, be1_l = [], [], [], []
    for lp, pln in zip(p["berry"], p["post_ln"]):
        w1, b1 = lp["bc_l1"]                        # [2H+3, H]: x_i | x_j | k_diff
        w_mi, w_mj, w_mk = w1[:H], w1[H:2 * H], w1[2 * H:]
        g_m, be_m = lp["bc_ln"]
        w_m2, b_m2 = lp["bc_l2"]
        w_e1, b_e1 = lp["eg_l1"]
        w_e2, b_e2 = lp["eg_l2"]
        wc, bc = lp["cmb_l"]                        # [2H, H]: berry | energy
        w_cb, w_ce = wc[:H], wc[H:]
        g_c, be_c = lp["cmb_ln"]
        g_p, be_p = pln
        Wbig_l.append(jnp.concatenate([w_mi, w_mj, w_m2, w_cb, w_ce, w_e2], axis=0))
        vec_l.append(jnp.stack([w_mk[0], w_mk[1], w_mk[2], b1, g_m, be_m, b_m2,
                                b_e2, bc, g_c, be_c, g_p, be_p], axis=0))   # [13, H]
        we1_l.append(w_e1)
        be1_l.append(r(b_e1))
    layers = (jnp.stack(Wbig_l),            # [L, 5H + H//2, H]
              jnp.stack(vec_l),             # [L, 13, H]
              jnp.stack(we1_l),             # [L, H, H//2]
              jnp.stack(be1_l))             # [L, 1, H//2]

    # ----- tail ----------------------------------------------------------------
    # Fold the seq_len==1 attention: softmax over a single key is exactly 1, so
    # attended = out_proj(v_proj(x)) = x @ (Wv Wo) + (bv Wo + bo).  Q/K drop out.
    wv, bv = p["attn"]["wv"], p["attn"]["bv"]
    wo, bo = p["attn"]["wo"], p["attn"]["bo"]
    w_att = wv @ wo
    b_att = r(bv @ wo + bo)

    head_keys = ["chern", "z2", "mirror"]
    out_dims = [1, 4, 2]
    hw1 = jnp.stack([p["topo"][k]["l1"][0] for k in head_keys])           # [3, H, th]
    hv1 = jnp.stack([jnp.stack([p["topo"][k]["l1"][1],
                                p["topo"][k]["ln"][0],
                                p["topo"][k]["ln"][1]], axis=0)
                     for k in head_keys])                                  # [3, 3, th]
    hw2 = jnp.stack([p["topo"][k]["l2"][0] for k in head_keys])           # [3, th, th//2]
    hb2 = jnp.stack([r(p["topo"][k]["l2"][1]) for k in head_keys])        # [3, 1, th//2]
    hw3 = jnp.stack([jnp.pad(p["topo"][k]["l3"][0], ((0, 0), (0, 4 - d)))
                     for k, d in zip(head_keys, out_dims)])                # [3, th//2, 4]
    hb3 = jnp.stack([jnp.pad(r(p["topo"][k]["l3"][1]), ((0, 0), (0, 4 - d)))
                     for k, d in zip(head_keys, out_dims)])                # [3, 1, 4]

    # output_proj: Linear(H+7, O), K-split: attended | chern | z2 | mirror.
    w_op, b_op = p["out_proj"]["l"]
    g_op, be_op = p["out_proj"]["ln"]
    wo_a = w_op[:H]                                                        # [H, O]
    wo_topo = jnp.stack([
        jnp.pad(w_op[H:H + 1], ((0, 3), (0, 0))),                          # chern
        w_op[H + 1:H + 5],                                                 # z2
        jnp.pad(w_op[H + 5:H + 7], ((0, 2), (0, 0))),                      # mirror
    ])                                                                     # [3, 4, O]
    out_vecs = jnp.stack([b_op, g_op, be_op], axis=0)                      # [3, O]

    tail = (w_att, b_att, hw1, hv1, hw2, hb2, hw3, hb3, wo_a, wo_topo, out_vecs)

    return {"sym_emb": p["bz"]["sym_emb"], "stem": stem,
            "layers": layers, "tail": tail}


# ----------------------------------------------------------------------------
# Forward pass (mirrors PhysicsInformedKSpaceEncoder.forward, eval mode)
# ----------------------------------------------------------------------------
def physics_informed_kspace_encoder(fp, x, edge_index, k_pos, batch,
                                    symmetry_labels, num_graphs):
    n_nodes, feat = x.shape
    H = fp["sym_emb"].shape[1]
    W_big, lvec, w_e1, b_e1 = fp["layers"]
    num_layers = W_big.shape[0]
    O = fp["tail"][-1].shape[-1]
    E = edge_index.shape[1]
    B = num_graphs

    # --- tiny graph-structure glue (plain JAX, built once per call) -------------
    src, dst = edge_index[0], edge_index[1]            # PyG flow: source -> target
    # Stacked edge one-hot [2E, N]: rows 0..E-1 gather x_i (dst), E..2E-1 gather
    # x_j (src); the scatter-add reuses rows 0..E-1 transposed inside the kernel.
    # TODO(synk): at realistic graph sizes replace these O(E*N) one-hot matrices
    # with scalar-prefetched edge indices + pl.ds row gathers (v7x VMEM = 64 MiB).
    gath = jnp.concatenate(
        [jax.nn.one_hot(dst, n_nodes, dtype=jnp.float32),
         jax.nn.one_hot(src, n_nodes, dtype=jnp.float32)], axis=0)        # [2E, N]
    # Layer-invariant k-space edge geometry, hoisted out of all Berry layers.
    k_diff = jnp.take(k_pos, dst, axis=0) - jnp.take(k_pos, src, axis=0)  # [E, 3]

    member = jax.nn.one_hot(batch, B, dtype=jnp.float32)                  # [N, B]
    counts = jnp.sum(member, axis=0)
    # Guard against empty graphs (counts == 0): zero features instead of NaN.
    pool = member.T / jnp.maximum(counts, 1.0)[:, None]                   # [B, N]

    has_sym = symmetry_labels is not None
    labels2d = (symmetry_labels.reshape(n_nodes, 1).astype(jnp.int32)
                if has_sym else jnp.zeros((n_nodes, 1), jnp.int32))

    inputs = [x, k_pos, labels2d, fp["sym_emb"], *fp["stem"],
              k_diff, gath, pool,
              W_big, lvec, w_e1, b_e1,
              *fp["tail"]]

    def const_spec(a):          # whole array, resident across all grid steps
        return pl.BlockSpec(a.shape, lambda l, _z=(0,) * a.ndim: _z)

    def layer_spec(a):          # one layer slab per grid step (prefetched)
        return pl.BlockSpec((1,) + a.shape[1:], lambda l: (l, 0, 0))

    in_specs = ([const_spec(a) for a in inputs[:11]]
                + [layer_spec(a) for a in (W_big, lvec, w_e1, b_e1)]
                + [const_spec(a) for a in fp["tail"]])

    th = H // 2
    flops = int(
        2 * n_nodes * H * (feat + H + 10)
        + num_layers * 2 * (2 * E * n_nodes * H + 3 * E * H * H
                            + E * n_nodes * H + 2 * n_nodes * H * (H // 2)
                            + 2 * n_nodes * H * H)
        + 2 * B * (n_nodes * H + H * H
                   + 3 * (H * th + th * (th // 2) + (th // 2) * 4)
                   + H * O + 12 * O))
    transc = int(n_nodes + num_layers * (E + 2 * n_nodes) + 4 * B)
    bytes_acc = int(4 * (sum(a.size for a in inputs) + B * O))
    cost = pl.CostEstimate(flops=flops, transcendentals=transc,
                           bytes_accessed=bytes_acc)

    grid_spec = pltpu.PrefetchScalarGridSpec(
        num_scalar_prefetch=0,
        grid=(num_layers,),
        in_specs=in_specs,
        out_specs=pl.BlockSpec((B, O), lambda l: (0, 0)),
        scratch_shapes=[pltpu.VMEM((n_nodes, H), jnp.float32)],   # node state h
    )

    kernel = functools.partial(_fused_kernel, n_edges=E, hidden=H, has_sym=has_sym)
    out = pl.pallas_call(
        kernel,
        grid_spec=grid_spec,
        out_shape=jax.ShapeDtypeStruct((B, O), jnp.float32),
        compiler_params=pltpu.CompilerParams(dimension_semantics=("arbitrary",)),
        cost_estimate=cost,
    )(*inputs)
    return out


# ----------------------------------------------------------------------------
# Example run
# ----------------------------------------------------------------------------
if __name__ == "__main__":
    NODE_FEATURE_DIM = 16
    HIDDEN_DIM = 32          # divisible by 8 (attention heads)
    NUM_LAYERS = 2
    OUTPUT_DIM = 16          # stands in for config.LATENT_DIM_GNN
    NUM_GRAPHS = 2
    NODES_PER_GRAPH = 8
    N = NUM_GRAPHS * NODES_PER_GRAPH

    key = jax.random.PRNGKey(0)
    kx, kpos, ksym, kparam = jax.random.split(key, 4)

    x = jax.random.normal(kx, (N, NODE_FEATURE_DIM), jnp.float32)
    k_pos = jax.random.normal(kpos, (N, 3), jnp.float32)
    batch = jnp.repeat(jnp.arange(NUM_GRAPHS, dtype=jnp.int32), NODES_PER_GRAPH)
    symmetry_labels = jax.random.randint(ksym, (N,), 0, 10, jnp.int32)

    # bidirectional ring within each graph -> E = 2 * N edges
    src_list, dst_list = [], []
    for g in range(NUM_GRAPHS):
        base = g * NODES_PER_GRAPH
        for i in range(NODES_PER_GRAPH):
            a = base + i
            b = base + (i + 1) % NODES_PER_GRAPH
            src_list += [a, b]
            dst_list += [b, a]
    edge_index = jnp.array([src_list, dst_list], dtype=jnp.int32)  # [2, E]

    raw_params = make_params(kparam, NODE_FEATURE_DIM, HIDDEN_DIM, NUM_LAYERS,
                             OUTPUT_DIM)
    fused_params = fuse_params(raw_params)

    fwd = jax.jit(functools.partial(physics_informed_kspace_encoder,
                                    num_graphs=NUM_GRAPHS))
    out = jax.block_until_ready(
        fwd(fused_params, x, edge_index, k_pos, batch, symmetry_labels))

    assert out.shape == (NUM_GRAPHS, OUTPUT_DIM), out.shape
    assert bool(jnp.all(jnp.isfinite(out)))
    print("KERNEL_OK")
</pallas_src>

<mosaic_0001>
module attributes {stable_mosaic.version = 11 : i64} {
  func.func @_fused_kernel(%arg0: i32, %arg1: memref<16x16xf32, #tpu.memory_space<vmem>>, %arg2: memref<16x3xf32, #tpu.memory_space<vmem>>, %arg3: memref<16x1xi32, #tpu.memory_space<vmem>>, %arg4: memref<10x32xf32, #tpu.memory_space<vmem>>, %arg5: memref<16x32xf32, #tpu.memory_space<vmem>>, %arg6: memref<3x32xf32, #tpu.memory_space<vmem>>, %arg7: memref<32x32xf32, #tpu.memory_space<vmem>>, %arg8: memref<5x32xf32, #tpu.memory_space<vmem>>, %arg9: memref<32x3xf32, #tpu.memory_space<vmem>>, %arg10: memref<64x16xf32, #tpu.memory_space<vmem>>, %arg11: memref<2x16xf32, #tpu.memory_space<vmem>>, %arg12: memref<1x176x32xf32, #tpu.memory_space<vmem>>, %arg13: memref<1x13x32xf32, #tpu.memory_space<vmem>>, %arg14: memref<1x32x16xf32, #tpu.memory_space<vmem>>, %arg15: memref<1x1x16xf32, #tpu.memory_space<vmem>>, %arg16: memref<32x32xf32, #tpu.memory_space<vmem>>, %arg17: memref<1x32xf32, #tpu.memory_space<vmem>>, %arg18: memref<3x32x16xf32, #tpu.memory_space<vmem>>, %arg19: memref<3x3x16xf32, #tpu.memory_space<vmem>>, %arg20: memref<3x16x8xf32, #tpu.memory_space<vmem>>, %arg21: memref<3x1x8xf32, #tpu.memory_space<vmem>>, %arg22: memref<3x8x4xf32, #tpu.memory_space<vmem>>, %arg23: memref<3x1x4xf32, #tpu.memory_space<vmem>>, %arg24: memref<32x16xf32, #tpu.memory_space<vmem>>, %arg25: memref<3x4x16xf32, #tpu.memory_space<vmem>>, %arg26: memref<3x16xf32, #tpu.memory_space<vmem>>, %arg27: memref<2x16xf32, #tpu.memory_space<vmem>>, %arg28: memref<16x32xf32, #tpu.memory_space<vmem>>) attributes {dimension_semantics = [#tpu.dimension_semantics<arbitrary>], iteration_bounds = array<i64: 2>, scalar_prefetch = 0 : i64, scratch_operands = 1 : i64, tpu.core_type = #tpu.core_type<tc>, window_params = [{pipeline_mode = #tpu.pipeline_mode<synchronous>, transform_indices = @transform_0, window_bounds = array<i64: 16, 16>}, {pipeline_mode = #tpu.pipeline_mode<synchronous>, transform_indices = @transform_1, window_bounds = array<i64: 16, 3>}, {pipeline_mode = #tpu.pipeline_mode<synchronous>, transform_indices = @transform_2, window_bounds = array<i64: 16, 1>}, {pipeline_mode = #tpu.pipeline_mode<synchronous>, transform_indices = @transform_3, window_bounds = array<i64: 10, 32>}, {pipeline_mode = #tpu.pipeline_mode<synchronous>, transform_indices = @transform_4, window_bounds = array<i64: 16, 32>}, {pipeline_mode = #tpu.pipeline_mode<synchronous>, transform_indices = @transform_5, window_bounds = array<i64: 3, 32>}, {pipeline_mode = #tpu.pipeline_mode<synchronous>, transform_indices = @transform_6, window_bounds = array<i64: 32, 32>}, {pipeline_mode = #tpu.pipeline_mode<synchronous>, transform_indices = @transform_7, window_bounds = array<i64: 5, 32>}, {pipeline_mode = #tpu.pipeline_mode<synchronous>, transform_indices = @transform_8, window_bounds = array<i64: 32, 3>}, {pipeline_mode = #tpu.pipeline_mode<synchronous>, transform_indices = @transform_9, window_bounds = array<i64: 64, 16>}, {pipeline_mode = #tpu.pipeline_mode<synchronous>, transform_indices = @transform_10, window_bounds = array<i64: 2, 16>}, {transform_indices = @transform_11, window_bounds = array<i64: 1, 176, 32>}, {transform_indices = @transform_12, window_bounds = array<i64: 1, 13, 32>}, {transform_indices = @transform_13, window_bounds = array<i64: 1, 32, 16>}, {transform_indices = @transform_14, window_bounds = array<i64: 1, 1, 16>}, {pipeline_mode = #tpu.pipeline_mode<synchronous>, transform_indices = @transform_15, window_bounds = array<i64: 32, 32>}, {pipeline_mode = #tpu.pipeline_mode<synchronous>, transform_indices = @transform_16, window_bounds = array<i64: 1, 32>}, {pipeline_mode = #tpu.pipeline_mode<synchronous>, transform_indices = @transform_17, window_bounds = array<i64: 3, 32, 16>}, {pipeline_mode = #tpu.pipeline_mode<synchronous>, transform_indices = @transform_18, window_bounds = array<i64: 3, 3, 16>}, {pipeline_mode = #tpu.pipeline_mode<synchronous>, transform_indices = @transform_19, window_bounds = array<i64: 3, 16, 8>}, {pipeline_mode = #tpu.pipeline_mode<synchronous>, transform_indices = @transform_20, window_bounds = array<i64: 3, 1, 8>}, {pipeline_mode = #tpu.pipeline_mode<synchronous>, transform_indices = @transform_21, window_bounds = array<i64: 3, 8, 4>}, {pipeline_mode = #tpu.pipeline_mode<synchronous>, transform_indices = @transform_22, window_bounds = array<i64: 3, 1, 4>}, {pipeline_mode = #tpu.pipeline_mode<synchronous>, transform_indices = @transform_23, window_bounds = array<i64: 32, 16>}, {pipeline_mode = #tpu.pipeline_mode<synchronous>, transform_indices = @transform_24, window_bounds = array<i64: 3, 4, 16>}, {pipeline_mode = #tpu.pipeline_mode<synchronous>, transform_indices = @transform_25, window_bounds = array<i64: 3, 16>}, {pipeline_mode = #tpu.pipeline_mode<synchronous>, transform_indices = @transform_26, window_bounds = array<i64: 2, 16>}]} {
    %c0_i32 = arith.constant 0 : i32
    %0 = arith.cmpi eq, %arg0, %c0_i32 : i32
    %1 = arith.extui %0 : i1 to i32
    %c0_i32_0 = arith.constant 0 : i32
    %2 = arith.cmpi ne, %1, %c0_i32_0 : i32
    scf.if %2 {
      %c0_47 = arith.constant 0 : index
      %c0_48 = arith.constant 0 : index
      %149 = vector.load %arg8[%c0_47, %c0_48] : memref<5x32xf32, #tpu.memory_space<vmem>>, vector<5x32xf32>
      %c0_49 = arith.constant 0 : index
      %c0_50 = arith.constant 0 : index
      %150 = vector.load %arg1[%c0_49, %c0_50] : memref<16x16xf32, #tpu.memory_space<vmem>>, vector<16x16xf32>
      %c0_51 = arith.constant 0 : index
      %c0_52 = arith.constant 0 : index
      %151 = vector.load %arg5[%c0_51, %c0_52] : memref<16x32xf32, #tpu.memory_space<vmem>>, vector<16x32xf32>
      %cst_53 = arith.constant dense<0.000000e+00> : vector<16x32xf32>
      %152 = tpu.matmul %150, %151, %cst_53 {dimension_numbers = #tpu.dot_dimension_numbers<[1], [0], [0], [1], [0, 0, 1, 1], [], []>} : vector<16x16xf32>, vector<16x32xf32>, vector<16x32xf32> -> vector<16x32xf32>
      %153 = vector.extract_strided_slice %149 {offsets = [0, 0], sizes = [1, 32], strides = [1, 1]} : vector<5x32xf32> to vector<1x32xf32>
      %154 = vector.broadcast %153 : vector<1x32xf32> to vector<16x32xf32>
      %155 = arith.addf %152, %154 : vector<16x32xf32>
      %cst_54 = arith.constant 0.000000e+00 : f32
      %156 = vector.broadcast %cst_54 : f32 to vector<16x32xf32>
      %157 = arith.maximumf %155, %156 : vector<16x32xf32>
      %c0_55 = arith.constant 0 : index
      %c0_56 = arith.constant 0 : index
      %158 = vector.load %arg2[%c0_55, %c0_56] : memref<16x3xf32, #tpu.memory_space<vmem>>, vector<16x3xf32>
      %c0_57 = arith.constant 0 : index
      %c0_58 = arith.constant 0 : index
      %159 = vector.load %arg6[%c0_57, %c0_58] : memref<3x32xf32, #tpu.memory_space<vmem>>, vector<3x32xf32>
      %160 = vector.extract_strided_slice %158 {offsets = [0, 0], sizes = [16, 1], strides = [1, 1]} : vector<16x3xf32> to vector<16x1xf32>
      %161 = vector.extract_strided_slice %159 {offsets = [0, 0], sizes = [1, 32], strides = [1, 1]} : vector<3x32xf32> to vector<1x32xf32>
      %162 = vector.broadcast %160 : vector<16x1xf32> to vector<16x32xf32>
      %163 = vector.broadcast %161 : vector<1x32xf32> to vector<16x32xf32>
      %164 = arith.mulf %162, %163 : vector<16x32xf32>
      %165 = vector.extract_strided_slice %158 {offsets = [0, 1], sizes = [16, 1], strides = [1, 1]} : vector<16x3xf32> to vector<16x1xf32>
      %166 = vector.extract_strided_slice %159 {offsets = [1, 0], sizes = [1, 32], strides = [1, 1]} : vector<3x32xf32> to vector<1x32xf32>
      %167 = vector.broadcast %165 : vector<16x1xf32> to vector<16x32xf32>
      %168 = vector.broadcast %166 : vector<1x32xf32> to vector<16x32xf32>
      %169 = arith.mulf %167, %168 : vector<16x32xf32>
      %170 = arith.addf %164, %169 : vector<16x32xf32>
      %171 = vector.extract_strided_slice %158 {offsets = [0, 2], sizes = [16, 1], strides = [1, 1]} : vector<16x3xf32> to vector<16x1xf32>
      %172 = vector.extract_strided_slice %159 {offsets = [2, 0], sizes = [1, 32], strides = [1, 1]} : vector<3x32xf32> to vector<1x32xf32>
      %173 = vector.broadcast %171 : vector<16x1xf32> to vector<16x32xf32>
      %174 = vector.broadcast %172 : vector<1x32xf32> to vector<16x32xf32>
      %175 = arith.mulf %173, %174 : vector<16x32xf32>
      %176 = arith.addf %170, %175 : vector<16x32xf32>
      %177 = vector.extract_strided_slice %149 {offsets = [1, 0], sizes = [1, 32], strides = [1, 1]} : vector<5x32xf32> to vector<1x32xf32>
      %178 = vector.broadcast %177 : vector<1x32xf32> to vector<16x32xf32>
      %179 = arith.addf %176, %178 : vector<16x32xf32>
      %180 = vector.extract_strided_slice %149 {offsets = [2, 0], sizes = [1, 32], strides = [1, 1]} : vector<5x32xf32> to vector<1x32xf32>
      %181 = vector.extract_strided_slice %149 {offsets = [3, 0], sizes = [1, 32], strides = [1, 1]} : vector<5x32xf32> to vector<1x32xf32>
      %cst_59 = arith.constant dense<0.000000e+00> : vector<16xf32>
      %182 = vector.multi_reduction <add>, %179, %cst_59 [1] : vector<16x32xf32> to vector<16xf32>
      %183 = vector.shape_cast %182 : vector<16xf32> to vector<16x1xf32>
      %cst_60 = arith.constant 3.200000e+01 : f32
      %184 = vector.broadcast %cst_60 : f32 to vector<16x1xf32>
      %185 = arith.divf %183, %184 : vector<16x1xf32>
      %186 = vector.broadcast %185 : vector<16x1xf32> to vector<16x32xf32>
      %187 = arith.subf %179, %186 : vector<16x32xf32>
      %188 = arith.mulf %187, %187 : vector<16x32xf32>
      %cst_61 = arith.constant dense<0.000000e+00> : vector<16xf32>
      %189 = vector.multi_reduction <add>, %188, %cst_61 [1] : vector<16x32xf32> to vector<16xf32>
      %190 = vector.shape_cast %189 : vector<16xf32> to vector<16x1xf32>
      %cst_62 = arith.constant 3.200000e+01 : f32
      %191 = vector.broadcast %cst_62 : f32 to vector<16x1xf32>
      %192 = arith.divf %190, %191 : vector<16x1xf32>
      %193 = vector.broadcast %185 : vector<16x1xf32> to vector<16x32xf32>
      %194 = arith.subf %179, %193 : vector<16x32xf32>
      %cst_63 = arith.constant 9.99999974E-6 : f32
      %195 = vector.broadcast %cst_63 : f32 to vector<16x1xf32>
      %196 = arith.addf %192, %195 : vector<16x1xf32>
      %197 = math.rsqrt %196 : vector<16x1xf32>
      %198 = vector.broadcast %197 : vector<16x1xf32> to vector<16x32xf32>
      %199 = arith.mulf %194, %198 : vector<16x32xf32>
      %200 = vector.broadcast %180 : vector<1x32xf32> to vector<16x32xf32>
      %201 = arith.mulf %199, %200 : vector<16x32xf32>
      %202 = vector.broadcast %181 : vector<1x32xf32> to vector<16x32xf32>
      %203 = arith.addf %201, %202 : vector<16x32xf32>
      %cst_64 = arith.constant 0.000000e+00 : f32
      %204 = vector.broadcast %cst_64 : f32 to vector<16x32xf32>
      %205 = arith.maximumf %203, %204 : vector<16x32xf32>
      %c0_65 = arith.constant 0 : index
      %c0_66 = arith.constant 0 : index
      %206 = vector.load %arg7[%c0_65, %c0_66] : memref<32x32xf32, #tpu.memory_space<vmem>>, vector<32x32xf32>
      %cst_67 = arith.constant dense<0.000000e+00> : vector<16x32xf32>
      %207 = tpu.matmul %205, %206, %cst_67 {dimension_numbers = #tpu.dot_dimension_numbers<[1], [0], [0], [1], [0, 0, 1, 1], [], []>} : vector<16x32xf32>, vector<32x32xf32>, vector<16x32xf32> -> vector<16x32xf32>
      %208 = vector.extract_strided_slice %149 {offsets = [4, 0], sizes = [1, 32], strides = [1, 1]} : vector<5x32xf32> to vector<1x32xf32>
      %209 = vector.broadcast %208 : vector<1x32xf32> to vector<16x32xf32>
      %210 = arith.addf %207, %209 : vector<16x32xf32>
      %c0_68 = arith.constant 0 : index
      %c0_69 = arith.constant 0 : index
      %211 = vector.load %arg3[%c0_68, %c0_69] : memref<16x1xi32, #tpu.memory_space<vmem>>, vector<16x1xi32>
      %212 = tpu.iota {dimensions = array<i32: 1>} : vector<16x10xi32>
      %213 = vector.broadcast %211 : vector<16x1xi32> to vector<16x10xi32>
      %214 = arith.cmpi eq, %213, %212 : vector<16x10xi32>
      %215 = arith.extui %214 : vector<16x10xi1> to vector<16x10xi32>
      %216 = arith.sitofp %215 : vector<16x10xi32> to vector<16x10xf32>
      %c0_70 = arith.constant 0 : index
      %c0_71 = arith.constant 0 : index
      %217 = vector.load %arg4[%c0_70, %c0_71] : memref<10x32xf32, #tpu.memory_space<vmem>>, vector<10x32xf32>
      %cst_72 = arith.constant dense<0.000000e+00> : vector<16x32xf32>
      %218 = tpu.matmul %216, %217, %cst_72 {dimension_numbers = #tpu.dot_dimension_numbers<[1], [0], [0], [1], [0, 0, 1, 1], [], []>} : vector<16x10xf32>, vector<10x32xf32>, vector<16x32xf32> -> vector<16x32xf32>
      %219 = arith.addf %210, %218 : vector<16x32xf32>
      %220 = arith.addf %157, %219 : vector<16x32xf32>
      %c0_73 = arith.constant 0 : index
      %c0_74 = arith.constant 0 : index
      %221 = vector.load %arg28[%c0_73, %c0_74] : memref<16x32xf32, #tpu.memory_space<vmem>>, vector<16x32xf32>
      tpu.vector_store %arg28[%c0_73, %c0_74], %220 {strides = array<i32>} : memref<16x32xf32, #tpu.memory_space<vmem>>, vector<16x32xf32>,
    } else {
    }
    %c0 = arith.constant 0 : index
    %c0_1 = arith.constant 0 : index
    %3 = vector.load %arg28[%c0, %c0_1] : memref<16x32xf32, #tpu.memory_space<vmem>>, vector<16x32xf32>
    %c0_2 = arith.constant 0 : index
    %c0_3 = arith.constant 0 : index
    %4 = vector.load %arg10[%c0_2, %c0_3] : memref<64x16xf32, #tpu.memory_space<vmem>>, vector<64x16xf32>
    %cst = arith.constant dense<0.000000e+00> : vector<64x32xf32>
    %5 = tpu.matmul %4, %3, %cst {dimension_numbers = #tpu.dot_dimension_numbers<[1], [0], [0], [1], [0, 0, 1, 1], [], []>} : vector<64x16xf32>, vector<16x32xf32>, vector<64x32xf32> -> vector<64x32xf32>
    %6 = vector.extract_strided_slice %5 {offsets = [0, 0], sizes = [32, 32], strides = [1, 1]} : vector<64x32xf32> to vector<32x32xf32>
    %7 = vector.extract_strided_slice %5 {offsets = [32, 0], sizes = [32, 32], strides = [1, 1]} : vector<64x32xf32> to vector<32x32xf32>
    %c0_4 = arith.constant 0 : index
    %c0_5 = arith.constant 0 : index
    %8 = vector.load %arg9[%c0_4, %c0_5] : memref<32x3xf32, #tpu.memory_space<vmem>>, vector<32x3xf32>
    %c0_6 = arith.constant 0 : index
    %c0_7 = arith.constant 0 : index
    %c0_8 = arith.constant 0 : index
    %9 = vector.load %arg12[%c0_6, %c0_7, %c0_8] : memref<1x176x32xf32, #tpu.memory_space<vmem>>, vector<1x176x32xf32>
    %10 = vector.shape_cast %9 : vector<1x176x32xf32> to vector<176x32xf32>
    %c0_9 = arith.constant 0 : index
    %c0_10 = arith.constant 0 : index
    %c0_11 = arith.constant 0 : index
    %11 = vector.load %arg13[%c0_9, %c0_10, %c0_11] : memref<1x13x32xf32, #tpu.memory_space<vmem>>, vector<1x13x32xf32>
    %12 = vector.shape_cast %11 : vector<1x13x32xf32> to vector<13x32xf32>
    %13 = vector.extract_strided_slice %10 {offsets = [0, 0], sizes = [32, 32], strides = [1, 1]} : vector<176x32xf32> to vector<32x32xf32>
    %14 = vector.extract_strided_slice %10 {offsets = [32, 0], sizes = [32, 32], strides = [1, 1]} : vector<176x32xf32> to vector<32x32xf32>
    %15 = vector.extract_strided_slice %10 {offsets = [64, 0], sizes = [32, 32], strides = [1, 1]} : vector<176x32xf32> to vector<32x32xf32>
    %16 = vector.extract_strided_slice %10 {offsets = [96, 0], sizes = [32, 32], strides = [1, 1]} : vector<176x32xf32> to vector<32x32xf32>
    %17 = vector.extract_strided_slice %10 {offsets = [128, 0], sizes = [32, 32], strides = [1, 1]} : vector<176x32xf32> to vector<32x32xf32>
    %18 = vector.extract_strided_slice %10 {offsets = [160, 0], sizes = [16, 32], strides = [1, 1]} : vector<176x32xf32> to vector<16x32xf32>
    %cst_12 = arith.constant dense<0.000000e+00> : vector<32x32xf32>
    %19 = tpu.matmul %6, %13, %cst_12 {dimension_numbers = #tpu.dot_dimension_numbers<[1], [0], [0], [1], [0, 0, 1, 1], [], []>} : vector<32x32xf32>, vector<32x32xf32>, vector<32x32xf32> -> vector<32x32xf32>
    %cst_13 = arith.constant dense<0.000000e+00> : vector<32x32xf32>
    %20 = tpu.matmul %7, %14, %cst_13 {dimension_numbers = #tpu.dot_dimension_numbers<[1], [0], [0], [1], [0, 0, 1, 1], [], []>} : vector<32x32xf32>, vector<32x32xf32>, vector<32x32xf32> -> vector<32x32xf32>
    %21 = arith.addf %19, %20 : vector<32x32xf32>
    %22 = vector.extract_strided_slice %8 {offsets = [0, 0], sizes = [32, 1], strides = [1, 1]} : vector<32x3xf32> to vector<32x1xf32>
    %23 = vector.extract_strided_slice %12 {offsets = [0, 0], sizes = [1, 32], strides = [1, 1]} : vector<13x32xf32> to vector<1x32xf32>
    %24 = vector.broadcast %22 : vector<32x1xf32> to vector<32x32xf32>
    %25 = vector.broadcast %23 : vector<1x32xf32> to vector<32x32xf32>
    %26 = arith.mulf %24, %25 : vector<32x32xf32>
    %27 = arith.addf %21, %26 : vector<32x32xf32>
    %28 = vector.extract_strided_slice %8 {offsets = [0, 1], sizes = [32, 1], strides = [1, 1]} : vector<32x3xf32> to vector<32x1xf32>
    %29 = vector.extract_strided_slice %12 {offsets = [1, 0], sizes = [1, 32], strides = [1, 1]} : vector<13x32xf32> to vector<1x32xf32>
    %30 = vector.broadcast %28 : vector<32x1xf32> to vector<32x32xf32>
    %31 = vector.broadcast %29 : vector<1x32xf32> to vector<32x32xf32>
    %32 = arith.mulf %30, %31 : vector<32x32xf32>
    %33 = arith.addf %27, %32 : vector<32x32xf32>
    %34 = vector.extract_strided_slice %8 {offsets = [0, 2], sizes = [32, 1], strides = [1, 1]} : vector<32x3xf32> to vector<32x1xf32>
    %35 = vector.extract_strided_slice %12 {offsets = [2, 0], sizes = [1, 32], strides = [1, 1]} : vector<13x32xf32> to vector<1x32xf32>
    %36 = vector.broadcast %34 : vector<32x1xf32> to vector<32x32xf32>
    %37 = vector.broadcast %35 : vector<1x32xf32> to vector<32x32xf32>
    %38 = arith.mulf %36, %37 : vector<32x32xf32>
    %39 = arith.addf %33, %38 : vector<32x32xf32>
    %40 = vector.extract_strided_slice %12 {offsets = [3, 0], sizes = [1, 32], strides = [1, 1]} : vector<13x32xf32> to vector<1x32xf32>
    %41 = vector.broadcast %40 : vector<1x32xf32> to vector<32x32xf32>
    %42 = arith.addf %39, %41 : vector<32x32xf32>
    %43 = vector.extract_strided_slice %12 {offsets = [4, 0], sizes = [1, 32], strides = [1, 1]} : vector<13x32xf32> to vector<1x32xf32>
    %44 = vector.extract_strided_slice %12 {offsets = [5, 0], sizes = [1, 32], strides = [1, 1]} : vector<13x32xf32> to vector<1x32xf32>
    %cst_14 = arith.constant dense<0.000000e+00> : vector<32xf32>
    %45 = vector.multi_reduction <add>, %42, %cst_14 [1] : vector<32x32xf32> to vector<32xf32>
    %46 = vector.shape_cast %45 : vector<32xf32> to vector<32x1xf32>
    %cst_15 = arith.constant 3.200000e+01 : f32
    %47 = vector.broadcast %cst_15 : f32 to vector<32x1xf32>
    %48 = arith.divf %46, %47 : vector<32x1xf32>
    %49 = vector.broadcast %48 : vector<32x1xf32> to vector<32x32xf32>
    %50 = arith.subf %42, %49 : vector<32x32xf32>
    %51 = arith.mulf %50, %50 : vector<32x32xf32>
    %cst_16 = arith.constant dense<0.000000e+00> : vector<32xf32>
    %52 = vector.multi_reduction <add>, %51, %cst_16 [1] : vector<32x32xf32> to vector<32xf32>
    %53 = vector.shape_cast %52 : vector<32xf32> to vector<32x1xf32>
    %cst_17 = arith.constant 3.200000e+01 : f32
    %54 = vector.broadcast %cst_17 : f32 to vector<32x1xf32>
    %55 = arith.divf %53, %54 : vector<32x1xf32>
    %56 = vector.broadcast %48 : vector<32x1xf32> to vector<32x32xf32>
    %57 = arith.subf %42, %56 : vector<32x32xf32>
    %cst_18 = arith.constant 9.99999974E-6 : f32
    %58 = vector.broadcast %cst_18 : f32 to vector<32x1xf32>
    %59 = arith.addf %55, %58 : vector<32x1xf32>
    %60 = math.rsqrt %59 : vector<32x1xf32>
    %61 = vector.broadcast %60 : vector<32x1xf32> to vector<32x32xf32>
    %62 = arith.mulf %57, %61 : vector<32x32xf32>
    %63 = vector.broadcast %43 : vector<1x32xf32> to vector<32x32xf32>
    %64 = arith.mulf %62, %63 : vector<32x32xf32>
    %65 = vector.broadcast %44 : vector<1x32xf32> to vector<32x32xf32>
    %66 = arith.addf %64, %65 : vector<32x32xf32>
    %cst_19 = arith.constant 0.000000e+00 : f32
    %67 = vector.broadcast %cst_19 : f32 to vector<32x32xf32>
    %68 = arith.maximumf %66, %67 : vector<32x32xf32>
    %cst_20 = arith.constant dense<0.000000e+00> : vector<32x32xf32>
    %69 = tpu.matmul %68, %15, %cst_20 {dimension_numbers = #tpu.dot_dimension_numbers<[1], [0], [0], [1], [0, 0, 1, 1], [], []>} : vector<32x32xf32>, vector<32x32xf32>, vector<32x32xf32> -> vector<32x32xf32>
    %70 = vector.extract_strided_slice %12 {offsets = [6, 0], sizes = [1, 32], strides = [1, 1]} : vector<13x32xf32> to vector<1x32xf32>
    %71 = vector.broadcast %70 : vector<1x32xf32> to vector<32x32xf32>
    %72 = arith.addf %69, %71 : vector<32x32xf32>
    %73 = vector.extract_strided_slice %4 {offsets = [0, 0], sizes = [32, 16], strides = [1, 1]} : vector<64x16xf32> to vector<32x16xf32>
    %cst_21 = arith.constant dense<0.000000e+00> : vector<16x32xf32>
    %74 = tpu.matmul %73, %72, %cst_21 {dimension_numbers = #tpu.dot_dimension_numbers<[0], [0], [1], [1], [0, 1, 1, 1], [], []>} : vector<32x16xf32>, vector<32x32xf32>, vector<16x32xf32> -> vector<16x32xf32>
    %c0_22 = arith.constant 0 : index
    %c0_23 = arith.constant 0 : index
    %c0_24 = arith.constant 0 : index
    %75 = vector.load %arg14[%c0_22, %c0_23, %c0_24] : memref<1x32x16xf32, #tpu.memory_space<vmem>>, vector<1x32x16xf32>
    %76 = vector.shape_cast %75 : vector<1x32x16xf32> to vector<32x16xf32>
    %cst_25 = arith.constant dense<0.000000e+00> : vector<16x16xf32>
    %77 = tpu.matmul %3, %76, %cst_25 {dimension_numbers = #tpu.dot_dimension_numbers<[1], [0], [0], [1], [0, 0, 1, 1], [], []>} : vector<16x32xf32>, vector<32x16xf32>, vector<16x16xf32> -> vector<16x16xf32>
    %c0_26 = arith.constant 0 : index
    %c0_27 = arith.constant 0 : index
    %c0_28 = arith.constant 0 : index
    %78 = vector.load %arg15[%c0_26, %c0_27, %c0_28] : memref<1x1x16xf32, #tpu.memory_space<vmem>>, vector<1x1x16xf32>
    %79 = vector.shape_cast %78 : vector<1x1x16xf32> to vector<1x16xf32>
    %80 = vector.broadcast %79 : vector<1x16xf32> to vector<16x16xf32>
    %81 = arith.addf %77, %80 : vector<16x16xf32>
    %cst_29 = arith.constant 0.000000e+00 : f32
    %82 = vector.broadcast %cst_29 : f32 to vector<16x16xf32>
    %83 = arith.maximumf %81, %82 : vector<16x16xf32>
    %cst_30 = arith.constant dense<0.000000e+00> : vector<16x32xf32>
    %84 = tpu.matmul %83, %18, %cst_30 {dimension_numbers = #tpu.dot_dimension_numbers<[1], [0], [0], [1], [0, 0, 1, 1], [], []>} : vector<16x16xf32>, vector<16x32xf32>, vector<16x32xf32> -> vector<16x32xf32>
    %85 = vector.extract_strided_slice %12 {offsets = [7, 0], sizes = [1, 32], strides = [1, 1]} : vector<13x32xf32> to vector<1x32xf32>
    %86 = vector.broadcast %85 : vector<1x32xf32> to vector<16x32xf32>
    %87 = arith.addf %84, %86 : vector<16x32xf32>
    %cst_31 = arith.constant dense<0.000000e+00> : vector<16x32xf32>
    %88 = tpu.matmul %74, %16, %cst_31 {dimension_numbers = #tpu.dot_dimension_numbers<[1], [0], [0], [1], [0, 0, 1, 1], [], []>} : vector<16x32xf32>, vector<32x32xf32>, vector<16x32xf32> -> vector<16x32xf32>
    %cst_32 = arith.constant dense<0.000000e+00> : vector<16x32xf32>
    %89 = tpu.matmul %87, %17, %cst_32 {dimension_numbers = #tpu.dot_dimension_numbers<[1], [0], [0], [1], [0, 0, 1, 1], [], []>} : vector<16x32xf32>, vector<32x32xf32>, vector<16x32xf32> -> vector<16x32xf32>
    %90 = arith.addf %88, %89 : vector<16x32xf32>
    %91 = vector.extract_strided_slice %12 {offsets = [8, 0], sizes = [1, 32], strides = [1, 1]} : vector<13x32xf32> to vector<1x32xf32>
    %92 = vector.broadcast %91 : vector<1x32xf32> to vector<16x32xf32>
    %93 = arith.addf %90, %92 : vector<16x32xf32>
    %94 = vector.extract_strided_slice %12 {offsets = [9, 0], sizes = [1, 32], strides = [1, 1]} : vector<13x32xf32> to vector<1x32xf32>
    %95 = vector.extract_strided_slice %12 {offsets = [10, 0], sizes = [1, 32], strides = [1, 1]} : vector<13x32xf32> to vector<1x32xf32>
    %cst_33 = arith.constant dense<0.000000e+00> : vector<16xf32>
    %96 = vector.multi_reduction <add>, %93, %cst_33 [1] : vector<16x32xf32> to vector<16xf32>
    %97 = vector.shape_cast %96 : vector<16xf32> to vector<16x1xf32>
    %cst_34 = arith.constant 3.200000e+01 : f32
    %98 = vector.broadcast %cst_34 : f32 to vector<16x1xf32>
    %99 = arith.divf %97, %98 : vector<16x1xf32>
    %100 = vector.broadcast %99 : vector<16x1xf32> to vector<16x32xf32>
    %101 = arith.subf %93, %100 : vector<16x32xf32>
    %102 = arith.mulf %101, %101 : vector<16x32xf32>
    %cst_35 = arith.constant dense<0.000000e+00> : vector<16xf32>
    %103 = vector.multi_reduction <add>, %102, %cst_35 [1] : vector<16x32xf32> to vector<16xf32>
    %104 = vector.shape_cast %103 : vector<16xf32> to vector<16x1xf32>
    %cst_36 = arith.constant 3.200000e+01 : f32
    %105 = vector.broadcast %cst_36 : f32 to vector<16x1xf32>
    %106 = arith.divf %104, %105 : vector<16x1xf32>
    %107 = vector.broadcast %99 : vector<16x1xf32> to vector<16x32xf32>
    %108 = arith.subf %93, %107 : vector<16x32xf32>
    %cst_37 = arith.constant 9.99999974E-6 : f32
    %109 = vector.broadcast %cst_37 : f32 to vector<16x1xf32>
    %110 = arith.addf %106, %109 : vector<16x1xf32>
    %111 = math.rsqrt %110 : vector<16x1xf32>
    %112 = vector.broadcast %111 : vector<16x1xf32> to vector<16x32xf32>
    %113 = arith.mulf %108, %112 : vector<16x32xf32>
    %114 = vector.broadcast %94 : vector<1x32xf32> to vector<16x32xf32>
    %115 = arith.mulf %113, %114 : vector<16x32xf32>
    %116 = vector.broadcast %95 : vector<1x32xf32> to vector<16x32xf32>
    %117 = arith.addf %115, %116 : vector<16x32xf32>
    %cst_38 = arith.constant 0.000000e+00 : f32
    %118 = vector.broadcast %cst_38 : f32 to vector<16x32xf32>
    %119 = arith.maximumf %117, %118 : vector<16x32xf32>
    %120 = arith.addf %119, %3 : vector<16x32xf32>
    %121 = vector.extract_strided_slice %12 {offsets = [11, 0], sizes = [1, 32], strides = [1, 1]} : vector<13x32xf32> to vector<1x32xf32>
    %122 = vector.extract_strided_slice %12 {offsets = [12, 0], sizes = [1, 32], strides = [1, 1]} : vector<13x32xf32> to vector<1x32xf32>
    %cst_39 = arith.constant dense<0.000000e+00> : vector<16xf32>
    %123 = vector.multi_reduction <add>, %120, %cst_39 [1] : vector<16x32xf32> to vector<16xf32>
    %124 = vector.shape_cast %123 : vector<16xf32> to vector<16x1xf32>
    %cst_40 = arith.constant 3.200000e+01 : f32
    %125 = vector.broadcast %cst_40 : f32 to vector<16x1xf32>
    %126 = arith.divf %124, %125 : vector<16x1xf32>
    %127 = vector.broadcast %126 : vector<16x1xf32> to vector<16x32xf32>
    %128 = arith.subf %120, %127 : vector<16x32xf32>
    %129 = arith.mulf %128, %128 : vector<16x32xf32>
    %cst_41 = arith.constant dense<0.000000e+00> : vector<16xf32>
    %130 = vector.multi_reduction <add>, %129, %cst_41 [1] : vector<16x32xf32> to vector<16xf32>
    %131 = vector.shape_cast %130 : vector<16xf32> to vector<16x1xf32>
    %cst_42 = arith.constant 3.200000e+01 : f32
    %132 = vector.broadcast %cst_42 : f32 to vector<16x1xf32>
    %133 = arith.divf %131, %132 : vector<16x1xf32>
    %134 = vector.broadcast %126 : vector<16x1xf32> to vector<16x32xf32>
    %135 = arith.subf %120, %134 : vector<16x32xf32>
    %cst_43 = arith.constant 9.99999974E-6 : f32
    %136 = vector.broadcast %cst_43 : f32 to vector<16x1xf32>
    %137 = arith.addf %133, %136 : vector<16x1xf32>
    %138 = math.rsqrt %137 : vector<16x1xf32>
    %139 = vector.broadcast %138 : vector<16x1xf32> to vector<16x32xf32>
    %140 = arith.mulf %135, %139 : vector<16x32xf32>
    %141 = vector.broadcast %121 : vector<1x32xf32> to vector<16x32xf32>
    %142 = arith.mulf %140, %141 : vector<16x32xf32>
    %143 = vector.broadcast %122 : vector<1x32xf32> to vector<16x32xf32>
    %144 = arith.addf %142, %143 : vector<16x32xf32>
    %c0_44 = arith.constant 0 : index
    %c0_45 = arith.constant 0 : index
    %145 = vector.load %arg28[%c0_44, %c0_45] : memref<16x32xf32, #tpu.memory_space<vmem>>, vector<16x32xf32>
    tpu.vector_store %arg28[%c0_44, %c0_45], %144 {strides = array<i32>} : memref<16x32xf32, #tpu.memory_space<vmem>>, vector<16x32xf32>,
    %c1_i32 = arith.constant 1 : i32
    %146 = arith.cmpi eq, %arg0, %c1_i32 : i32
    %147 = arith.extui %146 : i1 to i32
    %c0_i32_46 = arith.constant 0 : i32
    %148 = arith.cmpi ne, %147, %c0_i32_46 : i32
    scf.if %148 {
      %c0_47 = arith.constant 0 : index
      %c0_48 = arith.constant 0 : index
      %149 = vector.load %arg11[%c0_47, %c0_48] : memref<2x16xf32, #tpu.memory_space<vmem>>, vector<2x16xf32>
      %cst_49 = arith.constant dense<0.000000e+00> : vector<2x32xf32>
      %150 = tpu.matmul %149, %144, %cst_49 {dimension_numbers = #tpu.dot_dimension_numbers<[1], [0], [0], [1], [0, 0, 1, 1], [], []>} : vector<2x16xf32>, vector<16x32xf32>, vector<2x32xf32> -> vector<2x32xf32>
      %c0_50 = arith.constant 0 : index
      %c0_51 = arith.constant 0 : index
      %151 = vector.load %arg16[%c0_50, %c0_51] : memref<32x32xf32, #tpu.memory_space<vmem>>, vector<32x32xf32>
      %cst_52 = arith.constant dense<0.000000e+00> : vector<2x32xf32>
      %152 = tpu.matmul %150, %151, %cst_52 {dimension_numbers = #tpu.dot_dimension_numbers<[1], [0], [0], [1], [0, 0, 1, 1], [], []>} : vector<2x32xf32>, vector<32x32xf32>, vector<2x32xf32> -> vector<2x32xf32>
      %c0_53 = arith.constant 0 : index
      %c0_54 = arith.constant 0 : index
      %153 = vector.load %arg17[%c0_53, %c0_54] : memref<1x32xf32, #tpu.memory_space<vmem>>, vector<1x32xf32>
      %154 = vector.broadcast %153 : vector<1x32xf32> to vector<2x32xf32>
      %155 = arith.addf %152, %154 : vector<2x32xf32>
      %c0_55 = arith.constant 0 : index
      %c0_56 = arith.constant 0 : index
      %156 = vector.load %arg24[%c0_55, %c0_56] : memref<32x16xf32, #tpu.memory_space<vmem>>, vector<32x16xf32>
      %cst_57 = arith.constant dense<0.000000e+00> : vector<2x16xf32>
      %157 = tpu.matmul %155, %156, %cst_57 {dimension_numbers = #tpu.dot_dimension_numbers<[1], [0], [0], [1], [0, 0, 1, 1], [], []>} : vector<2x32xf32>, vector<32x16xf32>, vector<2x16xf32> -> vector<2x16xf32>
      %c0_58 = arith.constant 0 : index
      %c0_59 = arith.constant 0 : index
      %c0_60 = arith.constant 0 : index
      %158 = vector.load %arg19[%c0_58, %c0_59, %c0_60] : memref<3x3x16xf32, #tpu.memory_space<vmem>>, vector<1x3x16xf32>
      %159 = vector.shape_cast %158 : vector<1x3x16xf32> to vector<3x16xf32>
      %c0_61 = arith.constant 0 : index
      %c0_62 = arith.constant 0 : index
      %c0_63 = arith.constant 0 : index
      %160 = vector.load %arg18[%c0_61, %c0_62, %c0_63] : memref<3x32x16xf32, #tpu.memory_space<vmem>>, vector<1x32x16xf32>
      %161 = vector.shape_cast %160 : vector<1x32x16xf32> to vector<32x16xf32>
      %cst_64 = arith.constant dense<0.000000e+00> : vector<2x16xf32>
      %162 = tpu.matmul %150, %161, %cst_64 {dimension_numbers = #tpu.dot_dimension_numbers<[1], [0], [0], [1], [0, 0, 1, 1], [], []>} : vector<2x32xf32>, vector<32x16xf32>, vector<2x16xf32> -> vector<2x16xf32>
      %163 = vector.extract_strided_slice %159 {offsets = [0, 0], sizes = [1, 16], strides = [1, 1]} : vector<3x16xf32> to vector<1x16xf32>
      %164 = vector.broadcast %163 : vector<1x16xf32> to vector<2x16xf32>
      %165 = arith.addf %162, %164 : vector<2x16xf32>
      %166 = vector.extract_strided_slice %159 {offsets = [1, 0], sizes = [1, 16], strides = [1, 1]} : vector<3x16xf32> to vector<1x16xf32>
      %167 = vector.extract_strided_slice %159 {offsets = [2, 0], sizes = [1, 16], strides = [1, 1]} : vector<3x16xf32> to vector<1x16xf32>
      %cst_65 = arith.constant dense<0.000000e+00> : vector<2xf32>
      %168 = vector.multi_reduction <add>, %165, %cst_65 [1] : vector<2x16xf32> to vector<2xf32>
      %169 = vector.shape_cast %168 : vector<2xf32> to vector<2x1xf32>
      %cst_66 = arith.constant 1.600000e+01 : f32
      %170 = vector.broadcast %cst_66 : f32 to vector<2x1xf32>
      %171 = arith.divf %169, %170 : vector<2x1xf32>
      %172 = vector.broadcast %171 : vector<2x1xf32> to vector<2x16xf32>
      %173 = arith.subf %165, %172 : vector<2x16xf32>
      %174 = arith.mulf %173, %173 : vector<2x16xf32>
      %cst_67 = arith.constant dense<0.000000e+00> : vector<2xf32>
      %175 = vector.multi_reduction <add>, %174, %cst_67 [1] : vector<2x16xf32> to vector<2xf32>
      %176 = vector.shape_cast %175 : vector<2xf32> to vector<2x1xf32>
      %cst_68 = arith.constant 1.600000e+01 : f32
      %177 = vector.broadcast %cst_68 : f32 to vector<2x1xf32>
      %178 = arith.divf %176, %177 : vector<2x1xf32>
      %179 = vector.broadcast %171 : vector<2x1xf32> to vector<2x16xf32>
      %180 = arith.subf %165, %179 : vector<2x16xf32>
      %cst_69 = arith.constant 9.99999974E-6 : f32
      %181 = vector.broadcast %cst_69 : f32 to vector<2x1xf32>
      %182 = arith.addf %178, %181 : vector<2x1xf32>
      %183 = math.rsqrt %182 : vector<2x1xf32>
      %184 = vector.broadcast %183 : vector<2x1xf32> to vector<2x16xf32>
      %185 = arith.mulf %180, %184 : vector<2x16xf32>
      %186 = vector.broadcast %166 : vector<1x16xf32> to vector<2x16xf32>
      %187 = arith.mulf %185, %186 : vector<2x16xf32>
      %188 = vector.broadcast %167 : vector<1x16xf32> to vector<2x16xf32>
      %189 = arith.addf %187, %188 : vector<2x16xf32>
      %cst_70 = arith.constant 0.000000e+00 : f32
      %190 = vector.broadcast %cst_70 : f32 to vector<2x16xf32>
      %191 = arith.maximumf %189, %190 : vector<2x16xf32>
      %c0_71 = arith.constant 0 : index
      %c0_72 = arith.constant 0 : index
      %c0_73 = arith.constant 0 : index
      %192 = vector.load %arg20[%c0_71, %c0_72, %c0_73] : memref<3x16x8xf32, #tpu.memory_space<vmem>>, vector<1x16x8xf32>
      %193 = vector.shape_cast %192 : vector<1x16x8xf32> to vector<16x8xf32>
      %cst_74 = arith.constant dense<0.000000e+00> : vector<2x8xf32>
      %194 = tpu.matmul %191, %193, %cst_74 {dimension_numbers = #tpu.dot_dimension_numbers<[1], [0], [0], [1], [0, 0, 1, 1], [], []>} : vector<2x16xf32>, vector<16x8xf32>, vector<2x8xf32> -> vector<2x8xf32>
      %c0_75 = arith.constant 0 : index
      %c0_76 = arith.constant 0 : index
      %c0_77 = arith.constant 0 : index
      %195 = vector.load %arg21[%c0_75, %c0_76, %c0_77] : memref<3x1x8xf32, #tpu.memory_space<vmem>>, vector<1x1x8xf32>
      %196 = vector.shape_cast %195 : vector<1x1x8xf32> to vector<1x8xf32>
      %197 = vector.broadcast %196 : vector<1x8xf32> to vector<2x8xf32>
      %198 = arith.addf %194, %197 : vector<2x8xf32>
      %cst_78 = arith.constant 0.000000e+00 : f32
      %199 = vector.broadcast %cst_78 : f32 to vector<2x8xf32>
      %200 = arith.maximumf %198, %199 : vector<2x8xf32>
      %c0_79 = arith.constant 0 : index
      %c0_80 = arith.constant 0 : index
      %c0_81 = arith.constant 0 : index
      %201 = vector.load %arg22[%c0_79, %c0_80, %c0_81] : memref<3x8x4xf32, #tpu.memory_space<vmem>>, vector<1x8x4xf32>
      %202 = vector.shape_cast %201 : vector<1x8x4xf32> to vector<8x4xf32>
      %cst_82 = arith.constant dense<0.000000e+00> : vector<2x4xf32>
      %203 = tpu.matmul %200, %202, %cst_82 {dimension_numbers = #tpu.dot_dimension_numbers<[1], [0], [0], [1], [0, 0, 1, 1], [], []>} : vector<2x8xf32>, vector<8x4xf32>, vector<2x4xf32> -> vector<2x4xf32>
      %c0_83 = arith.constant 0 : index
      %c0_84 = arith.constant 0 : index
      %c0_85 = arith.constant 0 : index
      %204 = vector.load %arg23[%c0_83, %c0_84, %c0_85] : memref<3x1x4xf32, #tpu.memory_space<vmem>>, vector<1x1x4xf32>
      %205 = vector.shape_cast %204 : vector<1x1x4xf32> to vector<1x4xf32>
      %206 = vector.broadcast %205 : vector<1x4xf32> to vector<2x4xf32>
      %207 = arith.addf %203, %206 : vector<2x4xf32>
      %c0_86 = arith.constant 0 : index
      %c0_87 = arith.constant 0 : index
      %c0_88 = arith.constant 0 : index
      %208 = vector.load %arg25[%c0_86, %c0_87, %c0_88] : memref<3x4x16xf32, #tpu.memory_space<vmem>>, vector<1x4x16xf32>
      %209 = vector.shape_cast %208 : vector<1x4x16xf32> to vector<4x16xf32>
      %cst_89 = arith.constant dense<0.000000e+00> : vector<2x16xf32>
      %210 = tpu.matmul %207, %209, %cst_89 {dimension_numbers = #tpu.dot_dimension_numbers<[1], [0], [0], [1], [0, 0, 1, 1], [], []>} : vector<2x4xf32>, vector<4x16xf32>, vector<2x16xf32> -> vector<2x16xf32>
      %211 = arith.addf %157, %210 : vector<2x16xf32>
      %c1 = arith.constant 1 : index
      %c0_90 = arith.constant 0 : index
      %c0_91 = arith.constant 0 : index
      %212 = vector.load %arg19[%c1, %c0_90, %c0_91] : memref<3x3x16xf32, #tpu.memory_space<vmem>>, vector<1x3x16xf32>
      %213 = vector.shape_cast %212 : vector<1x3x16xf32> to vector<3x16xf32>
      %c1_92 = arith.constant 1 : index
      %c0_93 = arith.constant 0 : index
      %c0_94 = arith.constant 0 : index
      %214 = vector.load %arg18[%c1_92, %c0_93, %c0_94] : memref<3x32x16xf32, #tpu.memory_space<vmem>>, vector<1x32x16xf32>
      %215 = vector.shape_cast %214 : vector<1x32x16xf32> to vector<32x16xf32>
      %cst_95 = arith.constant dense<0.000000e+00> : vector<2x16xf32>
      %216 = tpu.matmul %150, %215, %cst_95 {dimension_numbers = #tpu.dot_dimension_numbers<[1], [0], [0], [1], [0, 0, 1, 1], [], []>} : vector<2x32xf32>, vector<32x16xf32>, vector<2x16xf32> -> vector<2x16xf32>
      %217 = vector.extract_strided_slice %213 {offsets = [0, 0], sizes = [1, 16], strides = [1, 1]} : vector<3x16xf32> to vector<1x16xf32>
      %218 = vector.broadcast %217 : vector<1x16xf32> to vector<2x16xf32>
      %219 = arith.addf %216, %218 : vector<2x16xf32>
      %220 = vector.extract_strided_slice %213 {offsets = [1, 0], sizes = [1, 16], strides = [1, 1]} : vector<3x16xf32> to vector<1x16xf32>
      %221 = vector.extract_strided_slice %213 {offsets = [2, 0], sizes = [1, 16], strides = [1, 1]} : vector<3x16xf32> to vector<1x16xf32>
      %cst_96 = arith.constant dense<0.000000e+00> : vector<2xf32>
      %222 = vector.multi_reduction <add>, %219, %cst_96 [1] : vector<2x16xf32> to vector<2xf32>
      %223 = vector.shape_cast %222 : vector<2xf32> to vector<2x1xf32>
      %cst_97 = arith.constant 1.600000e+01 : f32
      %224 = vector.broadcast %cst_97 : f32 to vector<2x1xf32>
      %225 = arith.divf %223, %224 : vector<2x1xf32>
      %226 = vector.broadcast %225 : vector<2x1xf32> to vector<2x16xf32>
      %227 = arith.subf %219, %226 : vector<2x16xf32>
      %228 = arith.mulf %227, %227 : vector<2x16xf32>
      %cst_98 = arith.constant dense<0.000000e+00> : vector<2xf32>
      %229 = vector.multi_reduction <add>, %228, %cst_98 [1] : vector<2x16xf32> to vector<2xf32>
      %230 = vector.shape_cast %229 : vector<2xf32> to vector<2x1xf32>
      %cst_99 = arith.constant 1.600000e+01 : f32
      %231 = vector.broadcast %cst_99 : f32 to vector<2x1xf32>
      %232 = arith.divf %230, %231 : vector<2x1xf32>
      %233 = vector.broadcast %225 : vector<2x1xf32> to vector<2x16xf32>
      %234 = arith.subf %219, %233 : vector<2x16xf32>
      %cst_100 = arith.constant 9.99999974E-6 : f32
      %235 = vector.broadcast %cst_100 : f32 to vector<2x1xf32>
      %236 = arith.addf %232, %235 : vector<2x1xf32>
      %237 = math.rsqrt %236 : vector<2x1xf32>
      %238 = vector.broadcast %237 : vector<2x1xf32> to vector<2x16xf32>
      %239 = arith.mulf %234, %238 : vector<2x16xf32>
      %240 = vector.broadcast %220 : vector<1x16xf32> to vector<2x16xf32>
      %241 = arith.mulf %239, %240 : vector<2x16xf32>
      %242 = vector.broadcast %221 : vector<1x16xf32> to vector<2x16xf32>
      %243 = arith.addf %241, %242 : vector<2x16xf32>
      %cst_101 = arith.constant 0.000000e+00 : f32
      %244 = vector.broadcast %cst_101 : f32 to vector<2x16xf32>
      %245 = arith.maximumf %243, %244 : vector<2x16xf32>
      %c1_102 = arith.constant 1 : index
      %c0_103 = arith.constant 0 : index
      %c0_104 = arith.constant 0 : index
      %246 = vector.load %arg20[%c1_102, %c0_103, %c0_104] : memref<3x16x8xf32, #tpu.memory_space<vmem>>, vector<1x16x8xf32>
      %247 = vector.shape_cast %246 : vector<1x16x8xf32> to vector<16x8xf32>
      %cst_105 = arith.constant dense<0.000000e+00> : vector<2x8xf32>
      %248 = tpu.matmul %245, %247, %cst_105 {dimension_numbers = #tpu.dot_dimension_numbers<[1], [0], [0], [1], [0, 0, 1, 1], [], []>} : vector<2x16xf32>, vector<16x8xf32>, vector<2x8xf32> -> vector<2x8xf32>
      %c1_106 = arith.constant 1 : index
      %c0_107 = arith.constant 0 : index
      %c0_108 = arith.constant 0 : index
      %249 = vector.load %arg21[%c1_106, %c0_107, %c0_108] : memref<3x1x8xf32, #tpu.memory_space<vmem>>, vector<1x1x8xf32>
      %250 = vector.shape_cast %249 : vector<1x1x8xf32> to vector<1x8xf32>
      %251 = vector.broadcast %250 : vector<1x8xf32> to vector<2x8xf32>
      %252 = arith.addf %248, %251 : vector<2x8xf32>
      %cst_109 = arith.constant 0.000000e+00 : f32
      %253 = vector.broadcast %cst_109 : f32 to vector<2x8xf32>
      %254 = arith.maximumf %252, %253 : vector<2x8xf32>
      %c1_110 = arith.constant 1 : index
      %c0_111 = arith.constant 0 : index
      %c0_112 = arith.constant 0 : index
      %255 = vector.load %arg22[%c1_110, %c0_111, %c0_112] : memref<3x8x4xf32, #tpu.memory_space<vmem>>, vector<1x8x4xf32>
      %256 = vector.shape_cast %255 : vector<1x8x4xf32> to vector<8x4xf32>
      %cst_113 = arith.constant dense<0.000000e+00> : vector<2x4xf32>
      %257 = tpu.matmul %254, %256, %cst_113 {dimension_numbers = #tpu.dot_dimension_numbers<[1], [0], [0], [1], [0, 0, 1, 1], [], []>} : vector<2x8xf32>, vector<8x4xf32>, vector<2x4xf32> -> vector<2x4xf32>
      %c1_114 = arith.constant 1 : index
      %c0_115 = arith.constant 0 : index
      %c0_116 = arith.constant 0 : index
      %258 = vector.load %arg23[%c1_114, %c0_115, %c0_116] : memref<3x1x4xf32, #tpu.memory_space<vmem>>, vector<1x1x4xf32>
      %259 = vector.shape_cast %258 : vector<1x1x4xf32> to vector<1x4xf32>
      %260 = vector.broadcast %259 : vector<1x4xf32> to vector<2x4xf32>
      %261 = arith.addf %257, %260 : vector<2x4xf32>
      %c1_117 = arith.constant 1 : index
      %c0_118 = arith.constant 0 : index
      %c0_119 = arith.constant 0 : index
      %262 = vector.load %arg25[%c1_117, %c0_118, %c0_119] : memref<3x4x16xf32, #tpu.memory_space<vmem>>, vector<1x4x16xf32>
      %263 = vector.shape_cast %262 : vector<1x4x16xf32> to vector<4x16xf32>
      %cst_120 = arith.constant dense<0.000000e+00> : vector<2x16xf32>
      %264 = tpu.matmul %261, %263, %cst_120 {dimension_numbers = #tpu.dot_dimension_numbers<[1], [0], [0], [1], [0, 0, 1, 1], [], []>} : vector<2x4xf32>, vector<4x16xf32>, vector<2x16xf32> -> vector<2x16xf32>
      %265 = arith.addf %211, %264 : vector<2x16xf32>
      %c2 = arith.constant 2 : index
      %c0_121 = arith.constant 0 : index
      %c0_122 = arith.constant 0 : index
      %266 = vector.load %arg19[%c2, %c0_121, %c0_122] : memref<3x3x16xf32, #tpu.memory_space<vmem>>, vector<1x3x16xf32>
      %267 = vector.shape_cast %266 : vector<1x3x16xf32> to vector<3x16xf32>
      %c2_123 = arith.constant 2 : index
      %c0_124 = arith.constant 0 : index
      %c0_125 = arith.constant 0 : index
      %268 = vector.load %arg18[%c2_123, %c0_124, %c0_125] : memref<3x32x16xf32, #tpu.memory_space<vmem>>, vector<1x32x16xf32>
      %269 = vector.shape_cast %268 : vector<1x32x16xf32> to vector<32x16xf32>
      %cst_126 = arith.constant dense<0.000000e+00> : vector<2x16xf32>
      %270 = tpu.matmul %150, %269, %cst_126 {dimension_numbers = #tpu.dot_dimension_numbers<[1], [0], [0], [1], [0, 0, 1, 1], [], []>} : vector<2x32xf32>, vector<32x16xf32>, vector<2x16xf32> -> vector<2x16xf32>
      %271 = vector.extract_strided_slice %267 {offsets = [0, 0], sizes = [1, 16], strides = [1, 1]} : vector<3x16xf32> to vector<1x16xf32>
      %272 = vector.broadcast %271 : vector<1x16xf32> to vector<2x16xf32>
      %273 = arith.addf %270, %272 : vector<2x16xf32>
      %274 = vector.extract_strided_slice %267 {offsets = [1, 0], sizes = [1, 16], strides = [1, 1]} : vector<3x16xf32> to vector<1x16xf32>
      %275 = vector.extract_strided_slice %267 {offsets = [2, 0], sizes = [1, 16], strides = [1, 1]} : vector<3x16xf32> to vector<1x16xf32>
      %cst_127 = arith.constant dense<0.000000e+00> : vector<2xf32>
      %276 = vector.multi_reduction <add>, %273, %cst_127 [1] : vector<2x16xf32> to vector<2xf32>
      %277 = vector.shape_cast %276 : vector<2xf32> to vector<2x1xf32>
      %cst_128 = arith.constant 1.600000e+01 : f32
      %278 = vector.broadcast %cst_128 : f32 to vector<2x1xf32>
      %279 = arith.divf %277, %278 : vector<2x1xf32>
      %280 = vector.broadcast %279 : vector<2x1xf32> to vector<2x16xf32>
      %281 = arith.subf %273, %280 : vector<2x16xf32>
      %282 = arith.mulf %281, %281 : vector<2x16xf32>
      %cst_129 = arith.constant dense<0.000000e+00> : vector<2xf32>
      %283 = vector.multi_reduction <add>, %282, %cst_129 [1] : vector<2x16xf32> to vector<2xf32>
      %284 = vector.shape_cast %283 : vector<2xf32> to vector<2x1xf32>
      %cst_130 = arith.constant 1.600000e+01 : f32
      %285 = vector.broadcast %cst_130 : f32 to vector<2x1xf32>
      %286 = arith.divf %284, %285 : vector<2x1xf32>
      %287 = vector.broadcast %279 : vector<2x1xf32> to vector<2x16xf32>
      %288 = arith.subf %273, %287 : vector<2x16xf32>
      %cst_131 = arith.constant 9.99999974E-6 : f32
      %289 = vector.broadcast %cst_131 : f32 to vector<2x1xf32>
      %290 = arith.addf %286, %289 : vector<2x1xf32>
      %291 = math.rsqrt %290 : vector<2x1xf32>
      %292 = vector.broadcast %291 : vector<2x1xf32> to vector<2x16xf32>
      %293 = arith.mulf %288, %292 : vector<2x16xf32>
      %294 = vector.broadcast %274 : vector<1x16xf32> to vector<2x16xf32>
      %295 = arith.mulf %293, %294 : vector<2x16xf32>
      %296 = vector.broadcast %275 : vector<1x16xf32> to vector<2x16xf32>
      %297 = arith.addf %295, %296 : vector<2x16xf32>
      %cst_132 = arith.constant 0.000000e+00 : f32
      %298 = vector.broadcast %cst_132 : f32 to vector<2x16xf32>
      %299 = arith.maximumf %297, %298 : vector<2x16xf32>
      %c2_133 = arith.constant 2 : index
      %c0_134 = arith.constant 0 : index
      %c0_135 = arith.constant 0 : index
      %300 = vector.load %arg20[%c2_133, %c0_134, %c0_135] : memref<3x16x8xf32, #tpu.memory_space<vmem>>, vector<1x16x8xf32>
      %301 = vector.shape_cast %300 : vector<1x16x8xf32> to vector<16x8xf32>
      %cst_136 = arith.constant dense<0.000000e+00> : vector<2x8xf32>
      %302 = tpu.matmul %299, %301, %cst_136 {dimension_numbers = #tpu.dot_dimension_numbers<[1], [0], [0], [1], [0, 0, 1, 1], [], []>} : vector<2x16xf32>, vector<16x8xf32>, vector<2x8xf32> -> vector<2x8xf32>
      %c2_137 = arith.constant 2 : index
      %c0_138 = arith.constant 0 : index
      %c0_139 = arith.constant 0 : index
      %303 = vector.load %arg21[%c2_137, %c0_138, %c0_139] : memref<3x1x8xf32, #tpu.memory_space<vmem>>, vector<1x1x8xf32>
      %304 = vector.shape_cast %303 : vector<1x1x8xf32> to vector<1x8xf32>
      %305 = vector.broadcast %304 : vector<1x8xf32> to vector<2x8xf32>
      %306 = arith.addf %302, %305 : vector<2x8xf32>
      %cst_140 = arith.constant 0.000000e+00 : f32
      %307 = vector.broadcast %cst_140 : f32 to vector<2x8xf32>
      %308 = arith.maximumf %306, %307 : vector<2x8xf32>
      %c2_141 = arith.constant 2 : index
      %c0_142 = arith.constant 0 : index
      %c0_143 = arith.constant 0 : index
      %309 = vector.load %arg22[%c2_141, %c0_142, %c0_143] : memref<3x8x4xf32, #tpu.memory_space<vmem>>, vector<1x8x4xf32>
      %310 = vector.shape_cast %309 : vector<1x8x4xf32> to vector<8x4xf32>
      %cst_144 = arith.constant dense<0.000000e+00> : vector<2x4xf32>
      %311 = tpu.matmul %308, %310, %cst_144 {dimension_numbers = #tpu.dot_dimension_numbers<[1], [0], [0], [1], [0, 0, 1, 1], [], []>} : vector<2x8xf32>, vector<8x4xf32>, vector<2x4xf32> -> vector<2x4xf32>
      %c2_145 = arith.constant 2 : index
      %c0_146 = arith.constant 0 : index
      %c0_147 = arith.constant 0 : index
      %312 = vector.load %arg23[%c2_145, %c0_146, %c0_147] : memref<3x1x4xf32, #tpu.memory_space<vmem>>, vector<1x1x4xf32>
      %313 = vector.shape_cast %312 : vector<1x1x4xf32> to vector<1x4xf32>
      %314 = vector.broadcast %313 : vector<1x4xf32> to vector<2x4xf32>
      %315 = arith.addf %311, %314 : vector<2x4xf32>
      %c2_148 = arith.constant 2 : index
      %c0_149 = arith.constant 0 : index
      %c0_150 = arith.constant 0 : index
      %316 = vector.load %arg25[%c2_148, %c0_149, %c0_150] : memref<3x4x16xf32, #tpu.memory_space<vmem>>, vector<1x4x16xf32>
      %317 = vector.shape_cast %316 : vector<1x4x16xf32> to vector<4x16xf32>
      %cst_151 = arith.constant dense<0.000000e+00> : vector<2x16xf32>
      %318 = tpu.matmul %315, %317, %cst_151 {dimension_numbers = #tpu.dot_dimension_numbers<[1], [0], [0], [1], [0, 0, 1, 1], [], []>} : vector<2x4xf32>, vector<4x16xf32>, vector<2x16xf32> -> vector<2x16xf32>
      %319 = arith.addf %265, %318 : vector<2x16xf32>
      %c0_152 = arith.constant 0 : index
      %c0_153 = arith.constant 0 : index
      %320 = vector.load %arg26[%c0_152, %c0_153] : memref<3x16xf32, #tpu.memory_space<vmem>>, vector<3x16xf32>
      %321 = vector.extract_strided_slice %320 {offsets = [0, 0], sizes = [1, 16], strides = [1, 1]} : vector<3x16xf32> to vector<1x16xf32>
      %322 = vector.broadcast %321 : vector<1x16xf32> to vector<2x16xf32>
      %323 = arith.addf %319, %322 : vector<2x16xf32>
      %324 = vector.extract_strided_slice %320 {offsets = [1, 0], sizes = [1, 16], strides = [1, 1]} : vector<3x16xf32> to vector<1x16xf32>
      %325 = vector.extract_strided_slice %320 {offsets = [2, 0], sizes = [1, 16], strides = [1, 1]} : vector<3x16xf32> to vector<1x16xf32>
      %cst_154 = arith.constant dense<0.000000e+00> : vector<2xf32>
      %326 = vector.multi_reduction <add>, %323, %cst_154 [1] : vector<2x16xf32> to vector<2xf32>
      %327 = vector.shape_cast %326 : vector<2xf32> to vector<2x1xf32>
      %cst_155 = arith.constant 1.600000e+01 : f32
      %328 = vector.broadcast %cst_155 : f32 to vector<2x1xf32>
      %329 = arith.divf %327, %328 : vector<2x1xf32>
      %330 = vector.broadcast %329 : vector<2x1xf32> to vector<2x16xf32>
      %331 = arith.subf %323, %330 : vector<2x16xf32>
      %332 = arith.mulf %331, %331 : vector<2x16xf32>
      %cst_156 = arith.constant dense<0.000000e+00> : vector<2xf32>
      %333 = vector.multi_reduction <add>, %332, %cst_156 [1] : vector<2x16xf32> to vector<2xf32>
      %334 = vector.shape_cast %333 : vector<2xf32> to vector<2x1xf32>
      %cst_157 = arith.constant 1.600000e+01 : f32
      %335 = vector.broadcast %cst_157 : f32 to vector<2x1xf32>
      %336 = arith.divf %334, %335 : vector<2x1xf32>
      %337 = vector.broadcast %329 : vector<2x1xf32> to vector<2x16xf32>
      %338 = arith.subf %323, %337 : vector<2x16xf32>
      %cst_158 = arith.constant 9.99999974E-6 : f32
      %339 = vector.broadcast %cst_158 : f32 to vector<2x1xf32>
      %340 = arith.addf %336, %339 : vector<2x1xf32>
      %341 = math.rsqrt %340 : vector<2x1xf32>
      %342 = vector.broadcast %341 : vector<2x1xf32> to vector<2x16xf32>
      %343 = arith.mulf %338, %342 : vector<2x16xf32>
      %344 = vector.broadcast %324 : vector<1x16xf32> to vector<2x16xf32>
      %345 = arith.mulf %343, %344 : vector<2x16xf32>
      %346 = vector.broadcast %325 : vector<1x16xf32> to vector<2x16xf32>
      %347 = arith.addf %345, %346 : vector<2x16xf32>
      %cst_159 = arith.constant 0.000000e+00 : f32
      %348 = vector.broadcast %cst_159 : f32 to vector<2x16xf32>
      %349 = arith.maximumf %347, %348 : vector<2x16xf32>
      %c0_160 = arith.constant 0 : index
      %c0_161 = arith.constant 0 : index
      %350 = vector.load %arg27[%c0_160, %c0_161] : memref<2x16xf32, #tpu.memory_space<vmem>>, vector<2x16xf32>
      tpu.vector_store %arg27[%c0_160, %c0_161], %349 {strides = array<i32>} : memref<2x16xf32, #tpu.memory_space<vmem>>, vector<2x16xf32>,
    } else {
    }
    return
  }
  func.func @transform_0(%arg0: i32) -> (i32, i32) {
    %c0_i32 = arith.constant 0 : i32
    %c0_i32_0 = arith.constant 0 : i32
    %c0_i32_1 = arith.constant 0 : i32
    return %c0_i32, %c0_i32_0 : i32, i32
  }
  func.func @transform_1(%arg0: i32) -> (i32, i32) {
    %c0_i32 = arith.constant 0 : i32
    %c0_i32_0 = arith.constant 0 : i32
    %c0_i32_1 = arith.constant 0 : i32
    return %c0_i32, %c0_i32_0 : i32, i32
  }
  func.func @transform_2(%arg0: i32) -> (i32, i32) {
    %c0_i32 = arith.constant 0 : i32
    %c0_i32_0 = arith.constant 0 : i32
    %c0_i32_1 = arith.constant 0 : i32
    return %c0_i32, %c0_i32_0 : i32, i32
  }
  func.func @transform_3(%arg0: i32) -> (i32, i32) {
    %c0_i32 = arith.constant 0 : i32
    %c0_i32_0 = arith.constant 0 : i32
    %c0_i32_1 = arith.constant 0 : i32
    return %c0_i32, %c0_i32_0 : i32, i32
  }
  func.func @transform_4(%arg0: i32) -> (i32, i32) {
    %c0_i32 = arith.constant 0 : i32
    %c0_i32_0 = arith.constant 0 : i32
    %c0_i32_1 = arith.constant 0 : i32
    return %c0_i32, %c0_i32_0 : i32, i32
  }
  func.func @transform_5(%arg0: i32) -> (i32, i32) {
    %c0_i32 = arith.constant 0 : i32
    %c0_i32_0 = arith.constant 0 : i32
    %c0_i32_1 = arith.constant 0 : i32
    return %c0_i32, %c0_i32_0 : i32, i32
  }
  func.func @transform_6(%arg0: i32) -> (i32, i32) {
    %c0_i32 = arith.constant 0 : i32
    %c0_i32_0 = arith.constant 0 : i32
    %c0_i32_1 = arith.constant 0 : i32
    return %c0_i32, %c0_i32_0 : i32, i32
  }
  func.func @transform_7(%arg0: i32) -> (i32, i32) {
    %c0_i32 = arith.constant 0 : i32
    %c0_i32_0 = arith.constant 0 : i32
    %c0_i32_1 = arith.constant 0 : i32
    return %c0_i32, %c0_i32_0 : i32, i32
  }
  func.func @transform_8(%arg0: i32) -> (i32, i32) {
    %c0_i32 = arith.constant 0 : i32
    %c0_i32_0 = arith.constant 0 : i32
    %c0_i32_1 = arith.constant 0 : i32
    return %c0_i32, %c0_i32_0 : i32, i32
  }
  func.func @transform_9(%arg0: i32) -> (i32, i32) {
    %c0_i32 = arith.constant 0 : i32
    %c0_i32_0 = arith.constant 0 : i32
    %c0_i32_1 = arith.constant 0 : i32
    return %c0_i32, %c0_i32_0 : i32, i32
  }
  func.func @transform_10(%arg0: i32) -> (i32, i32) {
    %c0_i32 = arith.constant 0 : i32
    %c0_i32_0 = arith.constant 0 : i32
    %c0_i32_1 = arith.constant 0 : i32
    return %c0_i32, %c0_i32_0 : i32, i32
  }
  func.func @transform_11(%arg0: i32) -> (i32, i32, i32) {
    %c0_i32 = arith.constant 0 : i32
    %c0_i32_0 = arith.constant 0 : i32
    %c0_i32_1 = arith.constant 0 : i32
    return %arg0, %c0_i32, %c0_i32_0 : i32, i32, i32
  }
  func.func @transform_12(%arg0: i32) -> (i32, i32, i32) {
    %c0_i32 = arith.constant 0 : i32
    %c0_i32_0 = arith.constant 0 : i32
    %c0_i32_1 = arith.constant 0 : i32
    return %arg0, %c0_i32, %c0_i32_0 : i32, i32, i32
  }
  func.func @transform_13(%arg0: i32) -> (i32, i32, i32) {
    %c0_i32 = arith.constant 0 : i32
    %c0_i32_0 = arith.constant 0 : i32
    %c0_i32_1 = arith.constant 0 : i32
    return %arg0, %c0_i32, %c0_i32_0 : i32, i32, i32
  }
  func.func @transform_14(%arg0: i32) -> (i32, i32, i32) {
    %c0_i32 = arith.constant 0 : i32
    %c0_i32_0 = arith.constant 0 : i32
    %c0_i32_1 = arith.constant 0 : i32
    return %arg0, %c0_i32, %c0_i32_0 : i32, i32, i32
  }
  func.func @transform_15(%arg0: i32) -> (i32, i32) {
    %c0_i32 = arith.constant 0 : i32
    %c0_i32_0 = arith.constant 0 : i32
    %c0_i32_1 = arith.constant 0 : i32
    return %c0_i32, %c0_i32_0 : i32, i32
  }
  func.func @transform_16(%arg0: i32) -> (i32, i32) {
    %c0_i32 = arith.constant 0 : i32
    %c0_i32_0 = arith.constant 0 : i32
    %c0_i32_1 = arith.constant 0 : i32
    return %c0_i32, %c0_i32_0 : i32, i32
  }
  func.func @transform_17(%arg0: i32) -> (i32, i32, i32) {
    %c0_i32 = arith.constant 0 : i32
    %c0_i32_0 = arith.constant 0 : i32
    %c0_i32_1 = arith.constant 0 : i32
    %c0_i32_2 = arith.constant 0 : i32
    return %c0_i32, %c0_i32_0, %c0_i32_1 : i32, i32, i32
  }
  func.func @transform_18(%arg0: i32) -> (i32, i32, i32) {
    %c0_i32 = arith.constant 0 : i32
    %c0_i32_0 = arith.constant 0 : i32
    %c0_i32_1 = arith.constant 0 : i32
    %c0_i32_2 = arith.constant 0 : i32
    return %c0_i32, %c0_i32_0, %c0_i32_1 : i32, i32, i32
  }
  func.func @transform_19(%arg0: i32) -> (i32, i32, i32) {
    %c0_i32 = arith.constant 0 : i32
    %c0_i32_0 = arith.constant 0 : i32
    %c0_i32_1 = arith.constant 0 : i32
    %c0_i32_2 = arith.constant 0 : i32
    return %c0_i32, %c0_i32_0, %c0_i32_1 : i32, i32, i32
  }
  func.func @transform_20(%arg0: i32) -> (i32, i32, i32) {
    %c0_i32 = arith.constant 0 : i32
    %c0_i32_0 = arith.constant 0 : i32
    %c0_i32_1 = arith.constant 0 : i32
    %c0_i32_2 = arith.constant 0 : i32
    return %c0_i32, %c0_i32_0, %c0_i32_1 : i32, i32, i32
  }
  func.func @transform_21(%arg0: i32) -> (i32, i32, i32) {
    %c0_i32 = arith.constant 0 : i32
    %c0_i32_0 = arith.constant 0 : i32
    %c0_i32_1 = arith.constant 0 : i32
    %c0_i32_2 = arith.constant 0 : i32
    return %c0_i32, %c0_i32_0, %c0_i32_1 : i32, i32, i32
  }
  func.func @transform_22(%arg0: i32) -> (i32, i32, i32) {
    %c0_i32 = arith.constant 0 : i32
    %c0_i32_0 = arith.constant 0 : i32
    %c0_i32_1 = arith.constant 0 : i32
    %c0_i32_2 = arith.constant 0 : i32
    return %c0_i32, %c0_i32_0, %c0_i32_1 : i32, i32, i32
  }
  func.func @transform_23(%arg0: i32) -> (i32, i32) {
    %c0_i32 = arith.constant 0 : i32
    %c0_i32_0 = arith.constant 0 : i32
    %c0_i32_1 = arith.constant 0 : i32
    return %c0_i32, %c0_i32_0 : i32, i32
  }
  func.func @transform_24(%arg0: i32) -> (i32, i32, i32) {
    %c0_i32 = arith.constant 0 : i32
    %c0_i32_0 = arith.constant 0 : i32
    %c0_i32_1 = arith.constant 0 : i32
    %c0_i32_2 = arith.constant 0 : i32
    return %c0_i32, %c0_i32_0, %c0_i32_1 : i32, i32, i32
  }
  func.func @transform_25(%arg0: i32) -> (i32, i32) {
    %c0_i32 = arith.constant 0 : i32
    %c0_i32_0 = arith.constant 0 : i32
    %c0_i32_1 = arith.constant 0 : i32
    return %c0_i32, %c0_i32_0 : i32, i32
  }
  func.func @transform_26(%arg0: i32) -> (i32, i32) {
    %c0_i32 = arith.constant 0 : i32
    %c0_i32_0 = arith.constant 0 : i32
    %c0_i32_1 = arith.constant 0 : i32
    return %c0_i32, %c0_i32_0 : i32, i32
  }
}

</mosaic_0001>

<bundles_post_ra>
// kernel: physics_informed_kspace_encoder.1
= control target key start
LH: loop header
LB: loop body
LE: loop exit
PB: predicated region body
PF: predicated region fallthrough
CT: control target
= control target key end

     0   :  { %s5248_s0 = inlined_call_operand.vmem [shape: f32[16,16], index: 0, kind: input, shape index: {}]   ;;  %s5249_s1 = inlined_call_operand.vmem [shape: f32[16,3], index: 1, kind: input, shape index: {}]   ;;  %s5250_s2 = inlined_call_operand.vmem [shape: s32[16,1], index: 2, kind: input, shape index: {}]   ;;  %s5251_s3 = inlined_call_operand.vmem [shape: f32[10,32], index: 3, kind: input, shape index: {}]   ;;  %s5252_s4 = inlined_call_operand.vmem [shape: f32[16,32], index: 4, kind: input, shape index: {}]   ;;  %s5253_s5 = inlined_call_operand.vmem [shape: f32[3,32], index: 5, kind: input, shape index: {}]   ;;  %s5254_s6 = inlined_call_operand.vmem [shape: f32[32,32], index: 6, kind: input, shape index: {}]   ;;  %s5255_s7 = inlined_call_operand.vmem [shape: f32[5,32], index: 7, kind: input, shape index: {}]   ;;  %s5256_s8 = inlined_call_operand.vmem [shape: f32[32,3], index: 8, kind: input, shape index: {}]   ;;  %s5257_s9 = inlined_call_operand.vmem [shape: f32[64,16], index: 9, kind: input, shape index: {}]   ;;  %s5258_s10 = inlined_call_operand.vmem [shape: f32[2,16], index: 10, kind: input, shape index: {}]   ;;  %s5259_s11 = inlined_call_operand.vmem [shape: f32[2,176,32], index: 11, kind: input, shape index: {}]   ;;  %s5260_s12 = inlined_call_operand.vmem [shape: f32[2,13,32], index: 12, kind: input, shape index: {}]   ;;  %s5261_s13 = inlined_call_operand.vmem [shape: f32[2,32,16], index: 13, kind: input, shape index: {}]   ;;  %s5262_s14 = inlined_call_operand.vmem [shape: f32[2,1,16], index: 14, kind: input, shape index: {}]   ;;  %s5263_s15 = inlined_call_operand.vmem [shape: f32[32,32], index: 15, kind: input, shape index: {}]   ;;  %s5264_s16 = inlined_call_operand.vmem [shape: f32[1,32], index: 16, kind: input, shape index: {}]   ;;  %s5265_s17 = inlined_call_operand.vmem [shape: f32[3,32,16], index: 17, kind: input, shape index: {}]   ;;  %s5266_s18 = inlined_call_operand.vmem [shape: f32[3,3,16], index: 18, kind: input, shape index: {}]   ;;  %s5267_s19 = inlined_call_operand.vmem [shape: f32[3,16,8], index: 19, kind: input, shape index: {}]   ;;  %s5268_s20 = inlined_call_operand.vmem [shape: f32[3,1,8], index: 20, kind: input, shape index: {}]   ;;  %s5269_s21 = inlined_call_operand.vmem [shape: f32[3,8,4], index: 21, kind: input, shape index: {}]   ;;  %s5270_s22 = inlined_call_operand.vmem [shape: f32[3,1,4], index: 22, kind: input, shape index: {}]   ;;  %s5271_s23 = inlined_call_operand.vmem [shape: f32[32,16], index: 23, kind: input, shape index: {}]   ;;  %s5272_s24 = inlined_call_operand.vmem [shape: f32[3,4,16], index: 24, kind: input, shape index: {}]   ;;  %s5273_s25 = inlined_call_operand.vmem [shape: f32[3,16], index: 25, kind: input, shape index: {}]   ;;  %s5274_s26 = inlined_call_operand.hbm [shape: f32[2,16], index: 26, kind: output, shape index: {}]  }
   0x1   :  { %5286 = sst [smem:[#allocation7_spill]] %s5248_s0 }
   0x2   :  { %5287 = sst [smem:[#allocation8_spill]] %s5249_s1 }
   0x3   :  { %5288 = sst [smem:[#allocation9_spill]] %s5250_s2 }
   0x4   :  { %5289 = sst [smem:[#allocation10_spill]] %s5251_s3 }
   0x5   :  { %5290 = sst [smem:[#allocation11_spill]] %s5252_s4 }
   0x6   :  { %5291 = sst [smem:[#allocation12_spill]] %s5253_s5 }
   0x7   :  { %5292 = sst [smem:[#allocation13_spill]] %s5254_s6 }
   0x8   :  { %5293 = sst [smem:[#allocation14_spill]] %s5255_s7 }
   0x9   :  { %5294 = sst [smem:[#allocation15_spill]] %s5256_s8 }
   0xa   :  { %5295 = sst [smem:[#allocation16_spill]] %s5257_s9 }
   0xb   :  { %5296 = sst [smem:[#allocation17_spill]] %s5258_s10 }
   0xc   :  { %5297 = sst [smem:[#allocation18_spill]] %s5259_s11 }
   0xd   :  { %5298 = sst [smem:[#allocation19_spill]] %s5260_s12 }
   0xe   :  { %5299 = sst [smem:[#allocation20_spill]] %s5261_s13 }
   0xf   :  { %5300 = sst [smem:[#allocation21_spill]] %s5273_s25 }
  0x10   :  { %5301 = sst [smem:[#allocation22_spill]] %s5274_s26 }
  0x11   :  { %31 = vsyncpa [#allocation4], 0  ;;  %s4672_s27 = smov 0  }
  0x12 LB: > { %5302 = sst [smem:[#allocation6_spill]] %s4523_s27  ;;  %s4678_s3 = sadd.s32 4294967295, %s4523_s27   ;;  %s4523_s27 = sphi %s4672_s27, %s37_s27  }
  0x13   : > { %p3807_p0 = scmp.ge.s32.totalorder %s4523_s27, 1  ;;  %p736_p1 = scmp.lt.s32.totalorder %s4523_s27, 3 }
  0x15   : > { %p737_p2 = pnand %p3807_p0, %p736_p1 }
  0x16   : > { %p814_p3 = scmp.lt.s32.totalorder (!%p737_p2), %s4678_s3, 1  ;;  %s5303_s12 = sld [smem:[#allocation19_spill]] (!%p737_p2) }
  0x17   : > { %740 = sbr.rel (%p737_p2) target bundleno = 6252 (0x186c), region = 124  ;;  %s5304_s11 = sld [smem:[#allocation18_spill]] (!%p737_p2) }
  0x18   : > { %s5305_s13 = sld [smem:[#allocation20_spill]] (!%p737_p2)  ;;  %p3813_p4 = scmp.ne.s32.totalorder (!%p737_p2), %s4678_s3, 0 }
  0x1e   : > { %s4684_s7 = scalar_select %p814_p3, %s4678_s3, 1 }
  0x1f   : > { %835 = sbr.rel (%p3813_p4) target bundleno = 719 (0x2cf), region = 128  ;;  %s5306_s29 = sld [smem:[#allocation8_spill]] (!%p3813_p4)  ;;  %v4525_v2 = vmov (!%p3813_p4), 0   ;;  %v4526_v3 = vmov (!%p3813_p4), 1   ;;  %v4527_v4 = vmov (!%p3813_p4), 2   ;;  %v841_v5 = vlaneseq (!%p3813_p4) }
  0x20   : > { %s4416_s28 = smul.u32 176, %s4684_s7  ;;  %s3906_s8 = sshll.u32 %s4684_s7, 4  ;;  %4446 = vset.pattern.permute.xlu1 (!%p3813_p4), %v4525_v2  ;;  %4444 = vset.pattern.permute.xlu0 (!%p3813_p4), %v4525_v2  ;;  %vm986_vm0 = vcmask (!%p3813_p4), 261120   ;;  %vm845_vm1 = vcmask (!%p3813_p4), 130048   ;;  %vm1142_vm2 = vcmask (!%p3813_p4), 1041408   ;;  %vm4528_vm3 = vmmov (!%p3813_p4), 1  }
  0x21   : > { %s4691_s0 = scalar_lea.vmem %s5303_s12, %s3906_s8  ;;  %s3907_s9 = sshll.u32 %s4684_s7, 5  ;;  %v4716_v6 = vshrl.u32 (!%p3813_p4), %v841_v5, 7  ;;  %vm4293_vm4 = vmpackc.low (!%p3813_p4), %vm1142_vm2, %vm4528_vm3  ;;  %vm1135_vm5 = vcmask (!%p3813_p4), 80896  }
  0x22   : > { %s4697_s5 = scalar_lea.vmem %s5304_s11, %s4416_s28  ;;  %s4702_s1 = scalar_lea.vmem %s5305_s13, %s3907_s9 }
  0x23   : > { %v958_v7 = vsub.s32 (!%p3813_p4), 1, %v4716_v6  ;;  %v843_v10 = vsub.s32 (!%p3813_p4), 0, %v4716_v6  ;;  %s5307_s27 = sld [smem:[#allocation12_spill]] (!%p3813_p4)  ;;  %v974_v13 = vsub.s32 (!%p3813_p4), 2, %v4716_v6  ;;  %s5308_s2 = sld [smem:[#allocation14_spill]] (!%p3813_p4) }
  0x24   : > { %s5309_s8 = sld [smem:[#allocation9_spill]] (!%p3813_p4)  ;;  %s5312_s13 = sld [smem:[#allocation11_spill]] (!%p3813_p4) }
  0x25   : > { %v930_v0 = vld [vmem:[%s5306_s29 + $0x8] sm:$0xff] (!%p3813_p4)  ;;  %v929_v1 = vld [vmem:[%s5306_s29] sm:$0xff] (!%p3813_p4) }
  0x26   : > { %939 = vperm.xlu1 %4446, %v930_v0   ;;  %934 = vperm.xlu0 %4444, %v929_v1  }
  0x29   : > { %v931_v11 = vld [vmem:[%s5307_s27] sm:$0x7]  ;;  %s5310_s27 = sld [smem:[#allocation13_spill]] }
  0x2a   : > { %4447 = vset.pattern.permute.xlu1 %v4526_v3  ;;  %4445 = vset.pattern.permute.xlu0 %v4526_v3  ;;  %v959_v12 = vrot.slane %v931_v11, %v958_v7  ;;  %v945_v14 = vrot.slane %v931_v11, %v843_v10  ;;  %v975_v19 = vrot.slane %v931_v11, %v974_v13  ;;  %v4731_v20 = vld [vmem:[%s5308_s2] sm:$0x1f]  ;;  %v1118_v47 = vld [vmem:[%s5309_s8 + $0x8] sm:$0xff]  ;;  %s5314_s2 = sld [smem:[#allocation10_spill]] }
  0x2b   : > { %953 = vperm.xlu1 %4447, %v930_v0   ;;  %949 = vperm.xlu0 %4445, %v929_v1   ;;  %v983_v25 = vrot.slane %v4731_v20, %v958_v7  ;;  %v1117_v46 = vld [vmem:[%s5309_s8] sm:$0xff]  ;;  %v840_v52 = vld [vmem:[%s5312_s13 + $0x8] sm:$0xff]  ;;  %s5313_s8 = sld [smem:[#allocation7_spill]] }
  0x2c   : > { %v839_v50 = vld [vmem:[%s5312_s13] sm:$0xff] }
  0x2d   : > { %v4280_v55 = vpack.c.bf16 %v840_v52, %v839_v50 }
  0x2f   : > { %4448 = vset.pattern.permute.xlu1 %v4527_v4  ;;  %4449 = vset.pattern.permute.xlu0 %v4527_v4  ;;  %s5311_s28 = smov %s5310_s27  ;;  %v1028_v48 = vld [vmem:[%s5310_s27] sm:$0xff] }
  0x30   : > { %965 = vperm.xlu1 %4448, %v929_v1   ;;  %969 = vperm.xlu0 %4449, %v930_v0   ;;  %v1029_v49 = vld [vmem:[%s5311_s28 + $0x8] sm:$0xff]  ;;  %v1030_v54 = vld [vmem:[%s5311_s28 + $0x10] sm:$0xff]  ;;  %v1031_v56 = vld [vmem:[%s5311_s28 + $0x18] sm:$0xff] }
  0x31   : > { %v4284_v51 = vpack.c.bf16 %v1029_v49, %v1028_v48  ;;  %v837_v53 = vld [vmem:[%s5313_s8] sm:$0xff]  ;;  %v4288_v58 = vpack.c.bf16 %v1031_v56, %v1030_v54  ;;  %v1134_v59 = vld [vmem:[%s5314_s2 + $0x8] sm:$0x3]  ;;  %4281 = vmatprep.subr.bf16.mxu0 %v4280_v55 }
  0x32   : > { %4037 = vmatprep.mubr.msk.f32.mxu0 %vm845_vm1, %v837_v53  ;;  %v1133_v57 = vld [vmem:[%s5314_s2] sm:$0xff]  ;;  %4283 = vmatpush3.bf16.msra.mxu0 %v4280_v55  ;;  %v838_v61 = vld [vmem:[%s5313_s8 + $0x8] sm:$0xff] }
  0x33   : > { %4285 = vmatprep.subr.bf16.mxu1 %v4284_v51  ;;  %v4292_v60 = vpack.c.bf16 %v1134_v59, %v1133_v57 }
  0x34   : > { %4450 = vset.pattern.permute.xlu1 %v4525_v2  ;;  %4451 = vset.pattern.permute.xlu0 %v4525_v2  ;;  %v1120_v2 = vand.u32 127, %v841_v5  ;;  %v1017_v5 = vrot.slane %v4731_v20, %v974_v13 }
  0x35   : > { %4287 = vmatpush3.bf16.msra.mxu1 %v4284_v51  ;;  %4294 = vmatprep.subr.msk.bf16.mxu0 %vm4293_vm4, %v4292_v60 }
  0x36   : > { %4289 = vmatprep.subr.bf16.mxu1 %v4288_v58  ;;  %4038 = vmatmul.mubr.msk.f32.vlgmr.msra.gmra.mrb[0].mxu0 %vm845_vm1, %v838_v61 }
  0x37   : > { %4297 = vmatpush3.bf16.msk.msra.mxu0 %vm4293_vm4, %v4292_v60 }
  0x39   : > { %4291 = vmatpush3.bf16.msra.mxu1 %v4288_v58 }
  0xa5   : > { %v940_v8 = vpop.permute.xlu1 %939  ;;  %v935_v9 = vpop.permute.xlu0 %934 }
  0xa6   : > { %v947_v21 = vmul.f32 %v945_v14, %v940_v8  ;;  %v946_v22 = vmul.f32 %v945_v14, %v935_v9  ;;  %v4529_v8 = vmov 0.0   ;;  %v1022_v14 = vsub.s32 3, %v4716_v6 }
  0xaa   : > { %v954_v15 = vpop.permute.xlu1 %953  ;;  %v950_v16 = vpop.permute.xlu0 %949 }
  0xab   : > { %v961_v17 = vmul.f32 %v959_v12, %v954_v15  ;;  %v960_v18 = vmul.f32 %v959_v12, %v950_v16 }
  0xad   : > { %v963_v26 = vadd.f32 %v961_v17, %v947_v21  ;;  %v962_v27 = vadd.f32 %v960_v18, %v946_v22  ;;  %v1023_v18 = vrot.slane %v4731_v20, %v1022_v14 }
  0xaf   : > { %v966_v23 = vpop.permute.xlu1 %965  ;;  %v970_v24 = vpop.permute.xlu0 %969 }
  0xb0   : > { %v976_v28 = vmul.f32 %v975_v19, %v966_v23  ;;  %v977_v29 = vmul.f32 %v975_v19, %v970_v24 }
  0xb2   : > { %v978_v30 = vadd.f32 %v976_v28, %v962_v27  ;;  %v979_v31 = vadd.f32 %v977_v29, %v963_v26 }
  0xb4   : > { %v985_v32 = vadd.f32 %v983_v25, %v979_v31  ;;  %v984_v33 = vadd.f32 %v983_v25, %v978_v30  ;;  %v1034_v30 = vsub.s32 4, %v4716_v6  ;;  %v844_v31 = vrot.slane %v4731_v20, %v843_v10 }
  0xb6   : > { %v990_v34 = vsel %vm986_vm0, %v985_v32, 0.0  ;;  %v987_v35 = vsel %vm986_vm0, %v984_v33, 0.0 }
  0xb7   : > { %991 = vadd.xlane.f32.xlu0 %v990_v34  ;;  %988 = vadd.xlane.f32.xlu1 %v987_v35 }
 0x109   : > { %v4039_v27 = vpop.f32.mrb[0].mxu0 }
 0x10a   : > { %v918_v13 = vpop.f32.mrb[1].mxu0 }
 0x10b   : > { %v919_v34 = vadd.f32 %v918_v13, %v844_v31 }
 0x144   : > { %v992_v36 = vpop.xlane.xlu0 %991  ;;  %v989_v37 = vpop.xlane.xlu1 %988 }
 0x145   : > { %v995_v38 = vmul.f32 0.03125, %v992_v36  ;;  %v994_v39 = vmul.f32 0.03125, %v989_v37 }
 0x147   : > { %v4736_v40 = vsub.f32 %v985_v32, %v995_v38  ;;  %v4738_v41 = vsub.f32 %v984_v33, %v994_v39  ;;  %v1035_v32 = vrot.slane %v4731_v20, %v1034_v30  ;;  %v924_v33 = vadd.f32 %v4039_v27, %v844_v31 }
 0x149   : > { %v999_v42 = vmul.f32 %v4736_v40, %v4736_v40  ;;  %v998_v43 = vmul.f32 %v4738_v41, %v4738_v41  ;;  %v928_v39 = vmax.f32 %v924_v33, 0.0 }
 0x14b   : > { %v1003_v44 = vsel %vm986_vm0, %v999_v42, 0.0  ;;  %v1000_v45 = vsel %vm986_vm0, %v998_v43, 0.0 }
 0x14c   : > { %1004 = vadd.xlane.f32.xlu0 %v1003_v44  ;;  %1001 = vadd.xlane.f32.xlu1 %v1000_v45 }
 0x15d   : > { %1122 = vperm.xlu1 %4450, %v1117_v46  }
 0x162   : > { %1125 = vperm.xlu0 %4451, %v1118_v47  }
 0x1d9   : > { %v1005_v62 = vpop.xlane.xlu0 %1004  ;;  %v1002_v63 = vpop.xlane.xlu1 %1001 }
 0x1da   : > { %v1007_v0 = vmul.f32 0.03125, %v1005_v62  ;;  %v1006_v1 = vmul.f32 0.03125, %v1002_v63 }
 0x1dc   : > { %v1009_v3 = vadd.f32 1e-05, %v1007_v0  ;;  %v1008_v4 = vadd.f32 1e-05, %v1006_v1 }
 0x1dd   : > { %v1123_v7 = vpop.permute.xlu1 %1122 }
 0x1de   : > { %4452 = vrsqrt.f32 %v1009_v3  ;;  %vm1127_vm6 = vcmp.eq.s32.totalorder %v1123_v7, %v1120_v2 }
 0x1df   : > { %4454 = vrsqrt.f32 %v1008_v4  ;;  %v3818_v9 = vsel %vm1127_vm6, 1.0, %v4529_v8 }
 0x1e0   : > { %4055 = vmatprep.mubr.msk.f32.mxu0 %vm1135_vm5, %v3818_v9 }
 0x1e1   : > { %v1126_v11 = vpop.permute.xlu0 %1125 }
 0x1e2   : > { %vm1128_vm7 = vcmp.eq.s32.totalorder %v1126_v11, %v1120_v2 }
 0x1e3   : > { %v3819_v12 = vsel %vm1128_vm7, 1.0, %v4529_v8 }
 0x1e4   : > { %4056 = vmatmul.mubr.msk.f32.vlgmr.msra.gmra.mrb[2].mxu0 %vm1135_vm5, %v3819_v12 }
 0x1e8   : > { %v4453_v15 = vpop.eup %4452 }
 0x1e9   : > { %v4455_v16 = vpop.eup %4454  ;;  %v1013_v17 = vmul.f32 %v4453_v15, %v4736_v40 }
 0x1ea   : > { %v1012_v19 = vmul.f32 %v4455_v16, %v4738_v41  ;;  %v927_v41 = vmax.f32 %v919_v34, 0.0 }
 0x1eb   : > { %v1019_v21 = vmul.f32 %v1017_v5, %v1013_v17 }
 0x1ec   : > { %v1018_v22 = vmul.f32 %v1017_v5, %v1012_v19 }
 0x1ed   : > { %v1025_v23 = vadd.f32 %v1023_v18, %v1019_v21 }
 0x1ee   : > { %v1024_v24 = vadd.f32 %v1023_v18, %v1018_v22 }
 0x1ef   : > { %v1027_v25 = vmax.f32 %v1025_v23, 0.0 }
 0x1f0   : > { %v1026_v26 = vmax.f32 %v1024_v24, 0.0 }
 0x1f2   : > { %4048 = vmatprep.mubr.msk.f32.mxu1 %vm986_vm0, %v1026_v26 }
 0x1f3   : > { %4049 = vmatmul.mubr.msk.f32.vlgmr.msra.gmra.mrb[0].mxu1 %vm986_vm0, %v1027_v25 }
 0x2b7   : > { %v4057_v28 = vpop.f32.mrb[2].mxu0 }
 0x2b8   : > { %v1212_v29 = vpop.f32.mrb[3].mxu0 }
 0x2c6   : > { %v4050_v35 = vpop.f32.mrb[0].mxu1 }
 0x2c7   : > { %v1114_v36 = vadd.f32 %v4050_v35, %v1035_v32  ;;  %v1108_v37 = vpop.f32.mrb[1].mxu1 }
 0x2c8   : > { %v1109_v38 = vadd.f32 %v1108_v37, %v1035_v32 }
 0x2c9   : > { %v1222_v40 = vadd.f32 %v4057_v28, %v1114_v36 }
 0x2ca   : > { %v1221_v42 = vadd.f32 %v1212_v29, %v1109_v38 }
 0x2cb   : > { %v1224_v43 = vadd.f32 %v1222_v40, %v928_v39 }
 0x2cc   : > { %v1223_v44 = vadd.f32 %v1221_v42, %v927_v41 }
 0x2cd   : > { %1226 = vst.msk [vmem:[#allocation2 + $0x8] sm:$0xff] %vm986_vm0, %v1224_v43 }
 0x2ce   : > { %1225 = vst.msk [vmem:[#allocation2] sm:$0xff] %vm986_vm0, %v1223_v44 }
 0x2cf PF: > { %s5315_s11 = sld [smem:[#allocation16_spill]]  ;;  %vm1237_vm8 = vcmask 130048   ;;  %v1375_v48 = vld [vmem:[%s4697_s5 + $0x20] sm:$0xff]  ;;  %v1376_v49 = vld [vmem:[%s4697_s5 + $0x28] sm:$0xff]  ;;  %v1377_v52 = vld [vmem:[%s4697_s5 + $0x30] sm:$0xff]  ;;  %s5316_s12 = sld [smem:[#allocation15_spill]]  ;;  %v1610_v24 = vlaneseq }
 0x2d0   : > { %v4302_v51 = vpack.c.bf16 %v1376_v49, %v1375_v48  ;;  %v1378_v53 = vld [vmem:[%s4697_s5 + $0x38] sm:$0xff]  ;;  %v1371_v59 = vld [vmem:[%s4697_s5] sm:$0xff]  ;;  %v1372_v60 = vld [vmem:[%s4697_s5 + $0x8] sm:$0xff]  ;;  %v4530_v63 = vmov 0   ;;  %v4531_v0 = vmov 1   ;;  %v4532_v3 = vmov 2   ;;  %s5317_s30 = scalar_lea.vmem %s5262_s14, %s4684_s7 }
 0x2d1   : > { %v4306_v56 = vpack.c.bf16 %v1378_v53, %v1377_v52  ;;  %v4310_v61 = vpack.c.bf16 %v1372_v60, %v1371_v59  ;;  %4456 = vset.pattern.permute.xlu0 %v4530_v63  ;;  %4457 = vset.pattern.permute.xlu1 %v4531_v0  ;;  %v1373_v7 = vld [vmem:[%s4697_s5 + $0x10] sm:$0xff]  ;;  %v1374_v8 = vld [vmem:[%s4697_s5 + $0x18] sm:$0xff]  ;;  %vm1395_vm9 = vcmask 261120   ;;  %v4879_v27 = vshrl.u32 %v1610_v24, 7  ;;  %v4888_v31 = vld [vmem:[%s4691_s0] sm:$0xff]  ;;  %p3854_p5 = scmp.ne.s32.totalorder %s4678_s3, 1 }
 0x2d2   : > { %v4314_v14 = vpack.c.bf16 %v1374_v8, %v1373_v7  ;;  %vm4534_vm10 = vmmov (!%p3854_p5), 0   ;;  %s5318_s4 = sld [smem:[#allocation17_spill]] (!%p3854_p5)  ;;  %vm2647_vm11 = vcmask (!%p3854_p5), 123904   ;;  %vm2843_vm12 = vcmask (!%p3854_p5), 1043456   ;;  %s5319_s27 = sld [smem:[#allocation21_spill]] (!%p3854_p5) }
 0x2d3   : > { %v4882_v13 = vsub.s32 0, %v4879_v27  ;;  %v4885_v29 = vsub.s32 1, %v4879_v27  ;;  %v4893_v33 = vsub.s32 2, %v4879_v27  ;;  %v1680_v39 = vsub.s32 3, %v4879_v27 }
 0x2d4   : > { %v4803_v10 = vld [vmem:[#allocation2 + $0x8] sm:$0xff]  ;;  %vm2764_vm13 = vcmask (!%p3854_p5), 64512   ;;  %vm2839_vm14 = vcmask (!%p3854_p5), 31744  }
 0x2d5   : > { %v4801_v6 = vld [vmem:[#allocation2] sm:$0xff]  ;;  %v1234_v47 = vld [vmem:[%s5315_s11 + $0x28] sm:$0xff]  ;;  %v1235_v54 = vld [vmem:[%s5315_s11 + $0x30] sm:$0xff]  ;;  %v1613_v32 = vrot.slane %v4888_v31, %v4882_v13  ;;  %v1641_v35 = vrot.slane %v4888_v31, %v4885_v29  ;;  %v1669_v38 = vrot.slane %v4888_v31, %v4893_v33  ;;  %v1681_v53 = vrot.slane %v4888_v31, %v1680_v39 }
 0x2d6   : > { %v1233_v20 = vld [vmem:[%s5315_s11 + $0x20] sm:$0xff]  ;;  %v4298_v45 = vpack.c.bf16 %v4803_v10, %v4801_v6  ;;  %v4824_v50 = vld [vmem:[%s5315_s11 + $0x8] sm:$0xff]  ;;  %v4836_v55 = vld [vmem:[%s5315_s11 + $0x10] sm:$0xff] }
 0x2d7   : > { %4068 = vmatprep.mubr.msk.f32.mxu1 %vm1237_vm8, %v1233_v20  ;;  %v4814_v46 = vld [vmem:[%s5315_s11] sm:$0xff]  ;;  %v1236_v57 = vld [vmem:[%s5315_s11 + $0x38] sm:$0xff]  ;;  %v1368_v1 = vld [vmem:[%s5316_s12 + $0x8] sm:$0xff] }
 0x2d8   : > { %4408 = vmatprep.subr.bf16.mxu1 %v4298_v45  ;;  %4299 = vmatprep.subr.bf16.mxu0 %v4298_v45  ;;  %v4850_v58 = vld [vmem:[%s5315_s11 + $0x18] sm:$0xff]  ;;  %v1367_v62 = vld [vmem:[%s5316_s12] sm:$0xff]  ;;  %v1369_v2 = vld [vmem:[%s5316_s12 + $0x10] sm:$0xff] }
 0x2d9   : > { %4409 = vmatpush3.bf16.msra.mxu1 %v4298_v45  ;;  %4301 = vmatpush3.bf16.msra.mxu0 %v4298_v45  ;;  %v1370_v4 = vld [vmem:[%s5316_s12 + $0x18] sm:$0xff] }
 0x2da   : > { %4062 = vmatprep.mubr.msk.f32.mxu0 %vm1237_vm8, %v4814_v46  ;;  %4303 = vmatprep.subr.bf16.mxu1 %v4302_v51 }
 0x2db   : > { %1592 = vperm.xlu0 %4456, %v1367_v62   ;;  %1623 = vperm.xlu1 %4457, %v1367_v62  }
 0x2dc   : > { %4069 = vmatmul.mubr.msk.f32.vlgmr.msra.gmra.mrb[0].mxu1 %vm1237_vm8, %v1234_v47  ;;  %4063 = vmatmul.mubr.msk.f32.vlgmr.msra.gmra.mrb[0].mxu0 %vm1237_vm8, %v4824_v50 }
 0x2dd   : > { %4071 = vmatprep.mubr.msk.f32.mxu1 %vm1237_vm8, %v1235_v54  ;;  %4065 = vmatprep.mubr.msk.f32.mxu0 %vm1237_vm8, %v4836_v55 }
 0x2de   : > { %4305 = vmatpush3.bf16.msra.mxu1 %v4302_v51 }
 0x2df   : > { %4307 = vmatprep.subr.bf16.mxu1 %v4306_v56  ;;  %1597 = vperm.xlu0 %4456, %v1368_v1  }
 0x2e0   : > { %4072 = vmatmul.mubr.msk.f32.gmra.mrb[2].mxu1 %vm1237_vm8, %v1236_v57  ;;  %4066 = vmatmul.mubr.msk.f32.gmra.mrb[2].mxu0 %vm1237_vm8, %v4850_v58 }
 0x2e1   : > { %1627 = vperm.xlu1 %4457, %v1368_v1  }
 0x2e2   : > { %4309 = vmatpush3.bf16.msra.mxu1 %v4306_v56 }
 0x2e3   : > { %4311 = vmatprep.subr.bf16.mxu1 %v4310_v61  ;;  %1602 = vperm.xlu0 %4456, %v1369_v2  }
 0x2e5   : > { %4458 = vset.pattern.permute.xlu1 %v4532_v3 }
 0x2e6   : > { %1651 = vperm.xlu1 %4458, %v1367_v62  }
 0x2e7   : > { %1607 = vperm.xlu0 %4456, %v1370_v4  }
 0x2ea   : > { %1655 = vperm.xlu1 %4458, %v1368_v1  }
 0x2eb   : > { %4459 = vset.pattern.permute.xlu0 %v4531_v0 }
 0x2ec   : > { %1631 = vperm.xlu0 %4459, %v1369_v2  }
 0x2ee   : > { %4460 = vset.pattern.permute.xlu1 %v4531_v0 }
 0x2ef   : > { %1635 = vperm.xlu1 %4460, %v1370_v4  }
 0x2f0   : > { %4462 = vset.pattern.permute.xlu0 %v4532_v3 }
 0x2f1   : > { %1663 = vperm.xlu0 %4462, %v1370_v4  }
 0x2f3   : > { %4461 = vset.pattern.permute.xlu1 %v4532_v3 }
 0x2f4   : > { %1659 = vperm.xlu1 %4461, %v1369_v2  }
 0x35a   : > { %v1593_v19 = vpop.permute.xlu0 %1592  ;;  %v1624_v21 = vpop.permute.xlu1 %1623 }
 0x35b   : > { %v1614_v40 = vmul.f32 %v1613_v32, %v1593_v19  ;;  %v1642_v20 = vmul.f32 %v1641_v35, %v1624_v21 }
 0x35e   : > { %v1598_v22 = vpop.permute.xlu0 %1597 }
 0x35f   : > { %v1615_v37 = vmul.f32 %v1613_v32, %v1598_v22 }
 0x360   : > { %v1628_v23 = vpop.permute.xlu1 %1627 }
 0x361   : > { %v1643_v42 = vmul.f32 %v1641_v35, %v1628_v23 }
 0x362   : > { %v1603_v25 = vpop.permute.xlu0 %1602 }
 0x363   : > { %v1616_v54 = vmul.f32 %v1613_v32, %v1603_v25 }
 0x365   : > { %v1652_v26 = vpop.permute.xlu1 %1651 }
 0x366   : > { %v1608_v28 = vpop.permute.xlu0 %1607  ;;  %v1670_v56 = vmul.f32 %v1669_v38, %v1652_v26 }
 0x367   : > { %v1617_v48 = vmul.f32 %v1613_v32, %v1608_v28 }
 0x369   : > { %v1656_v30 = vpop.permute.xlu1 %1655 }
 0x36a   : > { %v1671_v49 = vmul.f32 %v1669_v38, %v1656_v30 }
 0x36b   : > { %v1632_v34 = vpop.permute.xlu0 %1631 }
 0x36c   : > { %v1644_v1 = vmul.f32 %v1641_v35, %v1632_v34 }
 0x36e   : > { %v1636_v36 = vpop.permute.xlu1 %1635 }
 0x36f   : > { %v1645_v60 = vmul.f32 %v1641_v35, %v1636_v36 }
 0x370   : > { %v1664_v47 = vpop.permute.xlu0 %1663 }
 0x371   : > { %v1673_v63 = vmul.f32 %v1669_v38, %v1664_v47  ;;  %v1380_v47 = vld [vmem:[%s4697_s5 + $0x48] sm:$0xff] }
 0x373   : > { %v1660_v52 = vpop.permute.xlu1 %1659 }
 0x374   : > { %v1672_v3 = vmul.f32 %v1669_v38, %v1660_v52 }
 0x3af   : > { %v4070_v9 = vpop.f32.mrb[0].mxu1  ;;  %v4064_v11 = vpop.f32.mrb[0].mxu0 }
 0x3b0   : > { %v1348_v12 = vpop.f32.mrb[1].mxu1  ;;  %v1328_v5 = vpop.f32.mrb[1].mxu0 }
 0x3b1   : > { %4082 = vmatprep.mubr.msk.f32.mxu1 %vm1395_vm9, %v1348_v12 }
 0x3b2   : > { %4083 = vmatmul.mubr.msk.f32.vlgmr.msra.gmra.mrb[4].mxu1 %vm1395_vm9, %v4070_v9 }
 0x3b3   : > { %v4073_v15 = vpop.f32.mrb[2].mxu1  ;;  %4313 = vmatpush3.bf16.msra.mxu1 %v4310_v61  ;;  %v4067_v16 = vpop.f32.mrb[2].mxu0 }
 0x3b4   : > { %v1358_v17 = vpop.f32.mrb[3].mxu1  ;;  %4315 = vmatprep.subr.bf16.mxu1 %v4314_v14  ;;  %v1338_v18 = vpop.f32.mrb[3].mxu0 }
 0x3b5   : > { %4085 = vmatprep.mubr.msk.f32.mxu1 %vm1395_vm9, %v1358_v17 }
 0x3b6   : > { %4086 = vmatmul.mubr.msk.f32.gmra.mrb[6].mxu1 %vm1395_vm9, %v4073_v15 }
 0x3b7   : > { %4317 = vmatpush3.bf16.msra.mxu1 %v4314_v14  ;;  %4096 = vmatprep.mubr.msk.f32.mxu1 %vm1395_vm9, %v1328_v5 }
 0x3ba   : > { %4097 = vmatmul.mubr.msk.f32.vlgmr.msra.gmra.mrb[4].mxu1 %vm1395_vm9, %v4064_v11 }
 0x3bb   : > { %4099 = vmatprep.mubr.msk.f32.mxu1 %vm1395_vm9, %v1338_v18 }
 0x3be   : > { %4100 = vmatmul.mubr.msk.f32.gmra.mrb[6].mxu1 %vm1395_vm9, %v4067_v16 }
 0x48d   : > { %v4098_v41 = vpop.f32.mrb[4].mxu1 }
 0x48e   : > { %v1619_v43 = vadd.f32 %v4098_v41, %v1615_v37  ;;  %v1571_v44 = vpop.f32.mrb[5].mxu1 }
 0x48f   : > { %v1618_v45 = vadd.f32 %v1614_v40, %v1571_v44 }
 0x490   : > { %v1647_v51 = vadd.f32 %v1643_v42, %v1619_v43 }
 0x491   : > { %v1646_v57 = vadd.f32 %v1642_v20, %v1618_v45  ;;  %v4101_v59 = vpop.f32.mrb[6].mxu1  ;;  %v1379_v45 = vld [vmem:[%s4697_s5 + $0x40] sm:$0xff] }
 0x492   : > { %v1621_v61 = vadd.f32 %v4101_v59, %v1617_v48  ;;  %v1581_v62 = vpop.f32.mrb[7].mxu1  ;;  %v1675_v0 = vadd.f32 %v1671_v49, %v1647_v51  ;;  %v4318_v48 = vpack.c.bf16 %v1380_v47, %v1379_v45  ;;  %v1381_v49 = vld [vmem:[%s4697_s5 + $0x50] sm:$0xff]  ;;  %v1382_v51 = vld [vmem:[%s4697_s5 + $0x58] sm:$0xff] }
 0x493   : > { %v1620_v2 = vadd.f32 %v1616_v54, %v1581_v62  ;;  %v1674_v4 = vadd.f32 %v1670_v56, %v1646_v57  ;;  %v4322_v52 = vpack.c.bf16 %v1382_v51, %v1381_v49  ;;  %v1974_v54 = vld [vmem:[%s4702_s1 + $0x8] sm:$0xff]  ;;  %v1391_v49 = vld [vmem:[%s4697_s5 + $0xa0] sm:$0xff] }
 0x494   : > { %v1649_v7 = vadd.f32 %v1645_v60, %v1621_v61  ;;  %v1683_v8 = vadd.f32 %v1681_v53, %v1675_v0  ;;  %4319 = vmatprep.subr.bf16.mxu0 %v4318_v48  ;;  %v1392_v51 = vld [vmem:[%s4697_s5 + $0xa8] sm:$0xff] }
 0x495   : > { %v1648_v9 = vadd.f32 %v1644_v1, %v1620_v2  ;;  %v1682_v11 = vadd.f32 %v1681_v53, %v1674_v4  ;;  %4321 = vmatpush3.bf16.msra.mxu0 %v4318_v48 }
 0x496   : > { %v1677_v12 = vadd.f32 %v1673_v63, %v1649_v7  ;;  %v1689_v14 = vsel %vm1395_vm9, %v1683_v8, 0.0  ;;  %4323 = vmatprep.subr.bf16.mxu0 %v4322_v52 }
 0x497   : > { %v1676_v5 = vadd.f32 %v1672_v3, %v1648_v9  ;;  %1690 = vadd.xlane.f32.xlu0 %v1689_v14  ;;  %v1686_v15 = vsel %vm1395_vm9, %v1682_v11, 0.0 }
 0x498   : > { %1687 = vadd.xlane.f32.xlu1 %v1686_v15  ;;  %v1685_v16 = vadd.f32 %v1681_v53, %v1677_v12 }
 0x499   : > { %v1684_v17 = vadd.f32 %v1681_v53, %v1676_v5  ;;  %4325 = vmatpush3.bf16.msra.mxu0 %v4322_v52  ;;  %v1973_v53 = vld [vmem:[%s4702_s1] sm:$0xff] }
 0x49a   : > { %v1695_v18 = vsel %vm1395_vm9, %v1685_v16, 0.0  ;;  %v4334_v56 = vpack.c.bf16 %v1974_v54, %v1973_v53  ;;  %v3845_v53 = vld [vmem:[%s5317_s30] ss:$0 sm:$0xff] }
 0x49b   : > { %1696 = vadd.xlane.f32.xlu0 %v1695_v18  ;;  %v1692_v19 = vsel %vm1395_vm9, %v1684_v17, 0.0 }
 0x49c   : > { %1693 = vadd.xlane.f32.xlu1 %v1692_v19  ;;  %4335 = vmatprep.subr.bf16.mxu0 %v4334_v56 }
 0x524   : > { %v1691_v21 = vpop.xlane.xlu0 %1690 }
 0x525   : > { %v1700_v22 = vmul.f32 0.03125, %v1691_v21  ;;  %v1688_v23 = vpop.xlane.xlu1 %1687 }
 0x526   : > { %v1699_v24 = vmul.f32 0.03125, %v1688_v23  ;;  %v1976_v23 = vld [vmem:[%s4702_s1 + $0x18] sm:$0xff] }
 0x527   : > { %v1704_v25 = vsub.f32 %v1683_v8, %v1700_v22  ;;  %v1975_v22 = vld [vmem:[%s4702_s1 + $0x10] sm:$0xff] }
 0x528   : > { %v1703_v26 = vsub.f32 %v1682_v11, %v1699_v24  ;;  %v1697_v28 = vpop.xlane.xlu0 %1696 }
 0x529   : > { %v1702_v30 = vmul.f32 0.03125, %v1697_v28  ;;  %v1694_v32 = vpop.xlane.xlu1 %1693  ;;  %v1708_v34 = vmul.f32 %v1704_v25, %v1704_v25 }
 0x52a   : > { %v1701_v35 = vmul.f32 0.03125, %v1694_v32  ;;  %v1707_v36 = vmul.f32 %v1703_v26, %v1703_v26 }
 0x52b   : > { %v1706_v37 = vsub.f32 %v1685_v16, %v1702_v30  ;;  %v1714_v38 = vsel %vm1395_vm9, %v1708_v34, 0.0 }
 0x52c   : > { %v1705_v40 = vsub.f32 %v1684_v17, %v1701_v35  ;;  %1715 = vadd.xlane.f32.xlu0 %v1714_v38  ;;  %v1711_v41 = vsel %vm1395_vm9, %v1707_v36, 0.0  ;;  %v4338_v35 = vpack.c.bf16 %v1976_v23, %v1975_v22  ;;  %v1761_v38 = vsub.s32 6, %v4879_v27  ;;  %v4965_v22 = vld [vmem:[%s4691_s0 + $0x8] sm:$0x1f] }
 0x52d   : > { %1712 = vadd.xlane.f32.xlu1 %v1711_v41  ;;  %v1710_v42 = vmul.f32 %v1706_v37, %v1706_v37 }
 0x52e   : > { %v1709_v43 = vmul.f32 %v1705_v40, %v1705_v40 }
 0x52f   : > { %v1720_v44 = vsel %vm1395_vm9, %v1710_v42, 0.0 }
 0x530   : > { %1721 = vadd.xlane.f32.xlu0 %v1720_v44  ;;  %v1717_v20 = vsel %vm1395_vm9, %v1709_v43, 0.0 }
 0x531   : > { %1718 = vadd.xlane.f32.xlu1 %v1717_v20 }
 0x564   : > { %1860 = vxpose.xlu1.b32.start [1/4] (short) (narrow) %v4814_v46, 16 }
 0x568   : > { %1861 = vxpose.xlu1.b32.cont [2/4] (short) (narrow) %v4824_v50, 16  ;;  %v1741_v50 = vsub.s32 4, %v4879_v27 }
 0x56c   : > { %1862 = vxpose.xlu1.b32.cont [3/4] (short) (narrow) %v4836_v55, 16  ;;  %v1749_v55 = vsub.s32 5, %v4879_v27 }
 0x56e   : > { %v1750_v11 = vrot.slane %v4888_v31, %v1749_v55 }
 0x570   : > { %1863 = vxpose.xlu1.b32.end [4/4] (short) (narrow) %v4850_v58, 16  ;;  %v1742_v58 = vrot.slane %v4888_v31, %v1741_v50 }
 0x5b9   : > { %v1716_v57 = vpop.xlane.xlu0 %1715 }
 0x5ba   : > { %v1724_v59 = vmul.f32 0.03125, %v1716_v57  ;;  %v1713_v60 = vpop.xlane.xlu1 %1712  ;;  %v4342_v57 = vpack.c.bf16 %v1392_v51, %v1391_v49  ;;  %v2349_v51 = vrot.slane %v4965_v22, %v4885_v29 }
 0x5bb   : > { %v1723_v61 = vmul.f32 0.03125, %v1713_v60 }
 0x5bc   : > { %v1728_v62 = vadd.f32 1e-05, %v1724_v59 }
 0x5bd   : > { %v1727_v63 = vadd.f32 1e-05, %v1723_v61  ;;  %v1722_v0 = vpop.xlane.xlu0 %1721 }
 0x5be   : > { %4463 = vrsqrt.f32 %v1728_v62  ;;  %v1726_v1 = vmul.f32 0.03125, %v1722_v0  ;;  %v1719_v2 = vpop.xlane.xlu1 %1718 }
 0x5bf   : > { %4465 = vrsqrt.f32 %v1727_v63  ;;  %v1725_v3 = vmul.f32 0.03125, %v1719_v2  ;;  %v1388_v2 = vld [vmem:[%s4697_s5 + $0x88] sm:$0xff] }
 0x5c0   : > { %v1730_v4 = vadd.f32 1e-05, %v1726_v1  ;;  %v1387_v1 = vld [vmem:[%s4697_s5 + $0x80] sm:$0xff] }
 0x5c1   : > { %v1729_v46 = vadd.f32 1e-05, %v1725_v3  ;;  %v4346_v3 = vpack.c.bf16 %v1388_v2, %v1387_v1 }
 0x5c2   : > { %4467 = vrsqrt.f32 %v1730_v4  ;;  %v1389_v4 = vld [vmem:[%s4697_s5 + $0x90] sm:$0xff] }
 0x5c3   : > { %4469 = vrsqrt.f32 %v1729_v46  ;;  %v1390_v46 = vld [vmem:[%s4697_s5 + $0x98] sm:$0xff] }
 0x5c4   : > { %v4350_v55 = vpack.c.bf16 %v1390_v46, %v1389_v4 }
 0x5c8   : > { %v4464_v7 = vpop.eup %4463 }
 0x5c9   : > { %v4466_v8 = vpop.eup %4465  ;;  %v1736_v9 = vmul.f32 %v4464_v7, %v1704_v25  ;;  %v1384_v7 = vld [vmem:[%s4697_s5 + $0x68] sm:$0xff] }
 0x5ca   : > { %v1735_v12 = vmul.f32 %v4466_v8, %v1703_v26 }
 0x5cb   : > { %v1744_v14 = vmul.f32 %v1742_v58, %v1736_v9  ;;  %v2069_v9 = vsub.s32 7, %v4879_v27  ;;  %v2480_v27 = vld [vmem:[%s5263_s15] sm:$0xff] (!%p3854_p5) }
 0x5cc   : > { %v4468_v5 = vpop.eup %4467  ;;  %v1743_v15 = vmul.f32 %v1742_v58, %v1735_v12 }
 0x5cd   : > { %v4470_v16 = vpop.eup %4469  ;;  %v1752_v17 = vadd.f32 %v1750_v11, %v1744_v14  ;;  %v1738_v18 = vmul.f32 %v4468_v5, %v1706_v37  ;;  %v2070_v14 = vrot.slane %v4888_v31, %v2069_v9 }
 0x5ce   : > { %v1751_v19 = vadd.f32 %v1750_v11, %v1743_v15  ;;  %v1737_v21 = vmul.f32 %v4470_v16, %v1705_v40  ;;  %v1762_v40 = vrot.slane %v4888_v31, %v1761_v38  ;;  %v1385_v15 = vld [vmem:[%s4697_s5 + $0x70] sm:$0xff]  ;;  %v1386_v16 = vld [vmem:[%s4697_s5 + $0x78] sm:$0xff]  ;;  %v2317_v31 = vrot.slane %v4965_v22, %v4882_v13 }
 0x5cf   : > { %v1746_v24 = vmul.f32 %v1742_v58, %v1738_v18  ;;  %v1756_v32 = vmax.f32 %v1752_v17, 0.0 }
 0x5d0   : > { %v1755_v28 = vmax.f32 %v1751_v19, 0.0  ;;  %v1745_v30 = vmul.f32 %v1742_v58, %v1737_v21  ;;  %v1383_v58 = vld [vmem:[%s4697_s5 + $0x60] sm:$0xff]  ;;  %v4358_v21 = vpack.c.bf16 %v1386_v16, %v1385_v15 }
 0x5d1   : > { %v1754_v34 = vadd.f32 %v1750_v11, %v1746_v24  ;;  %v4354_v8 = vpack.c.bf16 %v1384_v7, %v1383_v58 }
 0x5d2   : > { %4110 = vmatprep.mubr.msk.f32.mxu0 %vm1395_vm9, %v1755_v28  ;;  %v1753_v25 = vadd.f32 %v1750_v11, %v1745_v30 }
 0x5d3   : > { %4111 = vmatmul.mubr.msk.f32.vlgmr.msra.gmra.mrb[4].mxu0 %vm1395_vm9, %v1756_v32  ;;  %v1758_v36 = vmax.f32 %v1754_v34, 0.0 }
 0x5d4   : > { %v1757_v26 = vmax.f32 %v1753_v25, 0.0  ;;  %4337 = vmatpush3.bf16.msra.mxu0 %v4334_v56 }
 0x5d5   : > { %4339 = vmatprep.subr.bf16.mxu0 %v4338_v35 }
 0x5d6   : > { %4113 = vmatprep.mubr.msk.f32.mxu0 %vm1395_vm9, %v1757_v26 }
 0x5d7   : > { %4114 = vmatmul.mubr.msk.f32.gmra.mrb[6].mxu0 %vm1395_vm9, %v1758_v36 }
 0x5d8   : > { %4341 = vmatpush3.bf16.msra.mxu0 %v4338_v35  ;;  %4135 = vmatprep.mubr.msk.f32.mxu0 %vm1395_vm9, %v4801_v6 }
 0x5d9   : > { %4347 = vmatprep.subr.bf16.mxu0 %v4346_v3 }
 0x5db   : > { %4136 = vmatmul.mubr.msk.f32.vlgmr.msra.gmra.mrb[8].mxu0 %vm1395_vm9, %v4803_v10 }
 0x5dc   : > { %4349 = vmatpush3.bf16.msra.mxu0 %v4346_v3 }
 0x5dd   : > { %4351 = vmatprep.subr.bf16.mxu0 %v4350_v55 }
 0x5e0   : > { %4353 = vmatpush3.bf16.msra.mxu0 %v4350_v55 }
 0x5e1   : > { %4355 = vmatprep.subr.bf16.mxu0 %v4354_v8 }
 0x5e4   : > { %v1876_v37 = vpop.trf.xlu1 }
 0x5e5   : > { %4124 = vmatprep.mubr.msk.f32.mxu1 %vm1395_vm9, %v1876_v37 }
 0x5e8   : > { %v1877_v61 = vpop.trf.xlu1 }
 0x6a6   : > { %v4112_v41 = vpop.f32.mrb[4].mxu0 }
 0x6a7   : > { %v1847_v42 = vadd.f32 %v4112_v41, %v1762_v40  ;;  %v1841_v43 = vpop.f32.mrb[5].mxu0 }
 0x6a8   : > { %v1842_v44 = vadd.f32 %v1841_v43, %v1762_v40 }
 0x6aa   : > { %v4326_v20 = vpack.c.bf16 %v1847_v42, %v1842_v44  ;;  %v4115_v45 = vpop.f32.mrb[6].mxu0 }
 0x6ab   : > { %v1857_v47 = vadd.f32 %v4115_v45, %v1762_v40  ;;  %v1851_v48 = vpop.f32.mrb[7].mxu0 }
 0x6ac   : > { %v1852_v52 = vadd.f32 %v1851_v48, %v1762_v40  ;;  %4327 = vmatprep.subr.bf16.mxu1 %v4326_v20 }
 0x6ad   : > { %4329 = vmatpush3.bf16.msra.mxu1 %v4326_v20 }
 0x6ae   : > { %v4330_v54 = vpack.c.bf16 %v1857_v47, %v1852_v52  ;;  %v4137_v56 = vpop.f32.mrb[8].mxu0 }
 0x6af   : > { %v2056_v59 = vpop.f32.mrb[9].mxu0  ;;  %v2062_v62 = vadd.f32 %v4137_v56, %v3845_v53 }
 0x6b0   : > { %4331 = vmatprep.subr.bf16.mxu1 %v4330_v54  ;;  %v2057_v60 = vadd.f32 %v3845_v53, %v2056_v59 }
 0x6b1   : > { %4333 = vmatpush3.bf16.msra.mxu1 %v4330_v54  ;;  %v2066_v0 = vmax.f32 %v2062_v62, 0.0  ;;  %v2355_v54 = vrot.slane %v4965_v22, %v4893_v33 }
 0x6b2   : > { %v2065_v63 = vmax.f32 %v2057_v60, 0.0  ;;  %4343 = vmatprep.subr.bf16.mxu1 %v4342_v57 }
 0x6b4   : > { %4125 = vmatmul.mubr.msk.f32.vlgmr.msra.gmra.mrb[8].mxu1 %vm1395_vm9, %v1877_v61 }
 0x6b5   : > { %4345 = vmatpush3.bf16.msra.mxu1 %v4342_v57  ;;  %4142 = vmatprep.mubr.msk.f32.mxu1 %vm1237_vm8, %v2065_v63 }
 0x6b8   : > { %4143 = vmatmul.mubr.msk.f32.vlgmr.msra.gmra.mrb[10].mxu1 %vm1237_vm8, %v2066_v0 }
 0x787   : > { %v4126_v11 = vpop.f32.mrb[8].mxu1 }
 0x788   : > { %v1964_v12 = vpop.f32.mrb[9].mxu1 }
 0x78b   : > { %v4144_v5 = vpop.f32.mrb[10].mxu1 }
 0x78c   : > { %v2143_v17 = vpop.f32.mrb[11].mxu1  ;;  %v2149_v19 = vadd.f32 %v4144_v5, %v2070_v14 }
 0x78d   : > { %v2144_v18 = vadd.f32 %v2143_v17, %v2070_v14 }
 0x78f   : > { %4153 = vmatprep.mubr.msk.f32.mxu0 %vm1395_vm9, %v2144_v18 }
 0x790   : > { %4154 = vmatmul.mubr.msk.f32.vlgmr.msra.gmra.mrb[10].mxu0 %vm1395_vm9, %v2149_v19  ;;  %v2391_v19 = vrot.slane %v4965_v22, %v1680_v39 }
 0x791   : > { %4357 = vmatpush3.bf16.msra.mxu0 %v4354_v8  ;;  %4164 = vmatprep.mubr.msk.f32.mxu0 %vm1395_vm9, %v1964_v12 }
 0x792   : > { %4359 = vmatprep.subr.bf16.mxu0 %v4358_v21 }
 0x795   : > { %4361 = vmatpush3.bf16.msra.mxu0 %v4358_v21 }
 0x798   : > { %4165 = vmatmul.mubr.msk.f32.vlgmr.msra.gmra.mrb[10].mxu0 %vm1395_vm9, %v4126_v11 }
 0x86b   : > { %v4166_v23 = vpop.f32.mrb[10].mxu0 }
 0x86c   : > { %v2305_v24 = vpop.f32.mrb[11].mxu0  ;;  %v2319_v30 = vadd.f32 %v4166_v23, %v2317_v31 }
 0x86d   : > { %v2318_v28 = vadd.f32 %v2317_v31, %v2305_v24  ;;  %v2397_v31 = vrot.slane %v4965_v22, %v1741_v50  ;;  %v4533_v50 = vmov (!%p3854_p5), 0.0|0.0   ;;  %v4535_v22 = vmov (!%p3854_p5), 0.0  }
 0x86e   : > { %v2323_v34 = vsel %vm1395_vm9, %v2319_v30, 0.0  ;;  %4362 = vmatprep.subr.bf16.mxu0 (!%p3854_p5), %v4533_v50  ;;  %4171 = vmatprep.mubr.msk.f32.mxu0 (!%p3854_p5), %vm4534_vm10, %v4535_v22 }
 0x86f   : > { %v2320_v32 = vsel %vm1395_vm9, %v2318_v28, 0.0  ;;  %4365 = vmatprep.subr.bf16.mxu1 (!%p3854_p5), %v4533_v50  ;;  %4182 = vmatprep.mubr.msk.f32.mxu1 (!%p3854_p5), %vm4534_vm10, %v4535_v22 }
 0x870   : > { %2321 = vadd.xlane.f32.xlu0 %v2320_v32 }
 0x874   : > { %2324 = vadd.xlane.f32.xlu0 %v2323_v34 }
 0x8fd   : > { %v2322_v35 = vpop.xlane.xlu0 %2321 }
 0x8fe   : > { %v2326_v25 = vmul.f32 0.03125, %v2322_v35 }
 0x900   : > { %v2328_v26 = vsub.f32 %v2318_v28, %v2326_v25  ;;  %v2481_v25 = vld [vmem:[%s5263_s15 + $0x8] sm:$0xff] (!%p3854_p5) }
 0x901   : > { %v2325_v36 = vpop.xlane.xlu0 %2324 }
 0x902   : > { %v2327_v37 = vmul.f32 0.03125, %v2325_v36  ;;  %v2330_v38 = vmul.f32 %v2328_v26, %v2328_v26  ;;  %v2570_v36 = vld [vmem:[%s5265_s17 + $0x8] sm:$0xff] (!%p3854_p5) }
 0x904   : > { %v2329_v40 = vsub.f32 %v2319_v30, %v2327_v37  ;;  %v2332_v41 = vsel %vm1395_vm9, %v2330_v38, 0.0  ;;  %v2406_v37 = vld [vmem:[%s5318_s4] sm:$0x3] (!%p3854_p5)  ;;  %v4366_v38 = vpack.c.bf16 (!%p3854_p5), %v2481_v25, %v2480_v27 }
 0x905   : > { %2333 = vadd.xlane.f32.xlu0 %v2332_v41  ;;  %v2482_v41 = vld [vmem:[%s5263_s15 + $0x10] sm:$0xff] (!%p3854_p5) }
 0x906   : > { %v2331_v42 = vmul.f32 %v2329_v40, %v2329_v40  ;;  %4367 = vmatpush3.bf16.msra.mxu1 (!%p3854_p5), %v4366_v38  ;;  %v3870_v38 = vld [vmem:[%s5265_s17 + $0x38] sm:$0xff] (!%p3854_p5) }
 0x907   : > { %4368 = vmatprep.subr.bf16.mxu1 (!%p3854_p5), %v4533_v50 }
 0x908   : > { %v2335_v43 = vsel %vm1395_vm9, %v2331_v42, 0.0  ;;  %v2483_v42 = vld [vmem:[%s5263_s15 + $0x18] sm:$0xff] (!%p3854_p5) }
 0x909   : > { %2336 = vadd.xlane.f32.xlu0 %v2335_v43  ;;  %v2571_v43 = vld [vmem:[%s5265_s17 + $0x10] sm:$0xff] (!%p3854_p5) }
 0x992   : > { %v2334_v44 = vpop.xlane.xlu0 %2333 }
 0x993   : > { %v2338_v20 = vmul.f32 0.03125, %v2334_v44  ;;  %v2572_v44 = vld [vmem:[%s5265_s17 + $0x18] sm:$0xff] (!%p3854_p5) }
 0x995   : > { %v2340_v45 = vadd.f32 1e-05, %v2338_v20  ;;  %v4369_v20 = vpack.c.bf16 (!%p3854_p5), %v2483_v42, %v2482_v41 }
 0x996   : > { %v2337_v47 = vpop.xlane.xlu0 %2336 }
 0x997   : > { %4471 = vrsqrt.f32 %v2340_v45  ;;  %v2339_v48 = vmul.f32 0.03125, %v2337_v47  ;;  %v4375_v45 = vpack.c.bf16 (!%p3854_p5), %v2572_v44, %v2571_v43  ;;  %4370 = vmatpush3.bf16.msra.mxu1 (!%p3854_p5), %v4369_v20 }
 0x998   : > { %4377 = vmatprep.subr.bf16.mxu1 (!%p3854_p5), %v4533_v50 }
 0x999   : > { %v2341_v49 = vadd.f32 1e-05, %v2339_v48 }
 0x99b   : > { %4473 = vrsqrt.f32 %v2341_v49  ;;  %v2568_v49 = vld [vmem:[%s5266_s18] sm:$0x7] (!%p3854_p5) }
 0x9a1   : > { %v4472_v52 = vpop.eup %4471 }
 0x9a2   : > { %v2344_v53 = vmul.f32 %v4472_v52, %v2328_v26  ;;  %v2569_v26 = vld [vmem:[%s5265_s17] sm:$0xff] (!%p3854_p5) }
 0x9a4   : > { %v2350_v56 = vmul.f32 %v2349_v51, %v2344_v53 }
 0x9a5   : > { %v4474_v57 = vpop.eup %4473 }
 0x9a6   : > { %v2356_v59 = vadd.f32 %v2355_v54, %v2350_v56  ;;  %v2345_v60 = vmul.f32 %v4474_v57, %v2329_v40  ;;  %v4372_v40 = vpack.c.bf16 (!%p3854_p5), %v2570_v36, %v2569_v26 }
 0x9a8   : > { %v2358_v61 = vmax.f32 %v2356_v59, 0.0  ;;  %v2351_v62 = vmul.f32 %v2349_v51, %v2345_v60  ;;  %v2576_v51 = vrot.slane (!%p3854_p5), %v2568_v49, %v4882_v13 }
 0x9aa   : > { %v2360_v63 = vadd.f32 %v2358_v61, %v4801_v6  ;;  %v2357_v0 = vadd.f32 %v2355_v54, %v2351_v62 }
 0x9ac   : > { %v2362_v1 = vsel %vm1395_vm9, %v2360_v63, 0.0  ;;  %v2359_v2 = vmax.f32 %v2357_v0, 0.0 }
 0x9ad   : > { %2363 = vadd.xlane.f32.xlu0 %v2362_v1  ;;  %v2673_v1 = vld [vmem:[%s5267_s19] sm:$0xff] (!%p3854_p5) }
 0x9ae   : > { %v2361_v3 = vadd.f32 %v2359_v2, %v4803_v10  ;;  %v2674_v2 = vld [vmem:[%s5267_s19 + $0x8] sm:$0xff] (!%p3854_p5) }
 0x9b0   : > { %v2365_v4 = vsel %vm1395_vm9, %v2361_v3, 0.0 }
 0x9b1   : > { %2366 = vadd.xlane.f32.xlu0 %v2365_v4 }
 0xa3a   : > { %v2364_v46 = vpop.xlane.xlu0 %2363 }
 0xa3b   : > { %v2368_v55 = vmul.f32 0.03125, %v2364_v46 }
 0xa3d   : > { %v2370_v58 = vsub.f32 %v2360_v63, %v2368_v55 }
 0xa3e   : > { %v2367_v7 = vpop.xlane.xlu0 %2366 }
 0xa3f   : > { %v2369_v8 = vmul.f32 0.03125, %v2367_v7  ;;  %v2372_v9 = vmul.f32 %v2370_v58, %v2370_v58 }
 0xa41   : > { %v2371_v11 = vsub.f32 %v2361_v3, %v2369_v8  ;;  %v2374_v12 = vsel %vm1395_vm9, %v2372_v9, 0.0  ;;  %v4378_v3 = vpack.c.bf16 (!%p3854_p5), %v2674_v2, %v2673_v1  ;;  %v2670_v8 = vrot.slane (!%p3854_p5), %v2568_v49, %v4893_v33 }
 0xa42   : > { %2375 = vadd.xlane.f32.xlu0 %v2374_v12 }
 0xa43   : > { %v2373_v6 = vmul.f32 %v2371_v11, %v2371_v11 }
 0xa45   : > { %v2377_v14 = vsel %vm1395_vm9, %v2373_v6, 0.0 }
 0xa46   : > { %2378 = vadd.xlane.f32.xlu0 %v2377_v14  ;;  %v2756_v14 = vld [vmem:[%s5269_s21] sm:$0xff] (!%p3854_p5) }
 0xacf   : > { %v2376_v5 = vpop.xlane.xlu0 %2375 }
 0xad0   : > { %v2380_v15 = vmul.f32 0.03125, %v2376_v5  ;;  %v2838_v5 = vld [vmem:[%s5272_s24] sm:$0xf] (!%p3854_p5) }
 0xad2   : > { %v2382_v10 = vadd.f32 1e-05, %v2380_v15  ;;  %v3859_v15 = vld [vmem:[%s5268_s20] ss:$0 sm:$0xff] (!%p3854_p5) }
 0xad3   : > { %v2379_v16 = vpop.xlane.xlu0 %2378 }
 0xad4   : > { %4475 = vrsqrt.f32 %v2382_v10  ;;  %v2381_v17 = vmul.f32 0.03125, %v2379_v16  ;;  %v2564_v10 = vld [vmem:[%s5271_s23] sm:$0xff] (!%p3854_p5)  ;;  %v2565_v16 = vld [vmem:[%s5271_s23 + $0x8] sm:$0xff] (!%p3854_p5) }
 0xad6   : > { %v2383_v18 = vadd.f32 1e-05, %v2381_v17 }
 0xad8   : > { %4477 = vrsqrt.f32 %v2383_v18 }
 0xade   : > { %v4476_v21 = vpop.eup %4475 }
 0xadf   : > { %v2386_v23 = vmul.f32 %v4476_v21, %v2370_v58  ;;  %v2665_v58 = vrot.slane (!%p3854_p5), %v2568_v49, %v4885_v29  ;;  %v4381_v21 = vpack.c.bf16 (!%p3854_p5), %v2565_v16, %v2564_v10 }
 0xae1   : > { %v2392_v24 = vmul.f32 %v2391_v19, %v2386_v23  ;;  %v2566_v23 = vld [vmem:[%s5271_s23 + $0x10] sm:$0xff] (!%p3854_p5) }
 0xae2   : > { %v4478_v28 = vpop.eup %4477 }
 0xae3   : > { %v2398_v30 = vadd.f32 %v2397_v31, %v2392_v24  ;;  %v2387_v32 = vmul.f32 %v4478_v28, %v2371_v11  ;;  %2405 = sbr.rel (%p3854_p5) target bundleno = 6221 (0x184d), region = 132  ;;  %v2567_v24 = vld [vmem:[%s5271_s23 + $0x18] sm:$0xff] (!%p3854_p5) }
 0xae4   : > { %v4384_v28 = vpack.c.bf16 (!%p3854_p5), %v2567_v24, %v2566_v23 }
 0xae5   : > { %2400 = vst.msk [vmem:[#allocation2] sm:$0xff] %vm1395_vm9, %v2398_v30  ;;  %v2393_v34 = vmul.f32 %v2391_v19, %v2387_v32 }
 0xae7   : > { %v2399_v35 = vadd.f32 %v2397_v31, %v2393_v34  ;;  %v3867_v34 = vld [vmem:[%s5265_s17 + $0x20] sm:$0xff] (!%p3854_p5) }
 0xae9   : > { %2401 = vst.msk [vmem:[#allocation2 + $0x8] sm:$0xff] %vm1395_vm9, %v2399_v35  ;;  %v4363_v39 = vpack.c.bf16 (!%p3854_p5), %v2399_v35, %v2398_v30  ;;  %v3856_v30 = vld [vmem:[%s5264_s16] ss:$0 sm:$0xff] (!%p3854_p5)  ;;  %v3868_v35 = vld [vmem:[%s5265_s17 + $0x28] sm:$0xff] (!%p3854_p5) }
 0xaea   : > { %v4387_v25 = vpack.c.bf16 %v3868_v35, %v3867_v34 }
 0xaeb   : > { %4364 = vmatpush3.bf16.msra.mxu0 %v4363_v39  ;;  %v3861_v39 = vld [vmem:[%s5270_s22] ss:$0 sm:$0xff] }
 0xaec   : > { %4371 = vmatprep.subr.bf16.mxu0 %v4533_v50 }
 0xaee   : > { %4172 = vmatmul.mubr.msk.f32.vlgmr.msra.gmra.mrb[0].mxu0 %vm1237_vm8, %v2406_v37  ;;  %v3869_v37 = vld [vmem:[%s5265_s17 + $0x30] sm:$0xff] }
 0xaef   : > { %4373 = vmatpush3.bf16.msra.mxu0 %v4372_v40  ;;  %4193 = vmatprep.mubr.msk.f32.mxu0 %vm4534_vm10, %v4535_v22  ;;  %v4390_v40 = vpack.c.bf16 %v3870_v38, %v3869_v37  ;;  %v3890_v37 = vld [vmem:[%s5267_s19 + $0x20] sm:$0xff]  ;;  %v3891_v38 = vld [vmem:[%s5267_s19 + $0x28] sm:$0xff] }
 0xaf0   : > { %4374 = vmatprep.subr.bf16.mxu0 %v4533_v50 }
 0xaf3   : > { %4376 = vmatpush3.bf16.msra.mxu0 %v4375_v45  ;;  %v3866_v45 = vld [vmem:[%s5266_s18 + $0x4] sm:$0x7] }
 0xaf4   : > { %4203 = vmatprep.subr.mxu0 %v4535_v22 }
 0xbc1   : > { %v5033_v47 = vpop.f32.mrb[0].mxu0 }
 0xbc2   : > { %v4173_v48 = vpop.f32.mrb[1].mxu0  ;;  %4183 = vmatmul.mubr.msk.f32.vlgmr.msra.gmra.mrb[0].mxu1 %vm1395_vm9, %v5033_v47  ;;  %4194 = vmatmul.mubr.msk.f32.vlgmr.msra.gmra.mrb[2].mxu0 %vm1395_vm9, %v5033_v47 }
 0xbc3   : > { %4200 = vmatprep.mubr.msk.f32.mxu1 %vm4534_vm10, %v4535_v22  ;;  %4205 = vmatprep.mubr.msk.f32.mxu0 %vm4534_vm10, %v4535_v22  ;;  %v3000_v48 = vrot.slane %v3866_v45, %v4882_v13 }
 0xbc4   : > { %4379 = vmatpush3.bf16.msra.mxu1 %v4378_v3  ;;  %4204 = vmatpush3.msra.mxu0 %v2756_v14  ;;  %v3087_v3 = vrot.slane %v3866_v45, %v4885_v29 }
 0xbc5   : > { %4208 = vmatprep.subr.mxu1 %v4535_v22  ;;  %4380 = vmatprep.subr.bf16.mxu0 %v4533_v50 }
 0xc95   : > { %v2560_v52 = vpop.f32.mrb[0].mxu1  ;;  %v2643_v53 = vpop.f32.mrb[2].mxu0 }
 0xc96   : > { %v2644_v54 = vadd.f32 %v2643_v53, %v2576_v51  ;;  %v4184_v56 = vpop.f32.mrb[1].mxu1  ;;  %v4195_v57 = vpop.f32.mrb[3].mxu0  ;;  %v2561_v32 = vadd.f32 %v3856_v30, %v2560_v52 }
 0xc98   : > { %v2648_v59 = vsel %vm2647_vm11, %v2644_v54, 0.0 }
 0xc99   : > { %2649 = vadd.xlane.f32.xlu0 %v2648_v59 }
 0xd26   : > { %v2650_v60 = vpop.xlane.xlu0 %2649 }
 0xd27   : > { %v2652_v61 = vmul.f32 0.0625, %v2650_v60 }
 0xd29   : > { %v2653_v62 = vsub.f32 %v2644_v54, %v2652_v61  ;;  %v3872_v61 = vld [vmem:[%s5267_s19 + $0x10] sm:$0xff] }
 0xd2b   : > { %v2654_v63 = vmul.f32 %v2653_v62, %v2653_v62 }
 0xd2d   : > { %v2655_v0 = vsel %vm2647_vm11, %v2654_v63, 0.0 }
 0xd2e   : > { %2656 = vadd.xlane.f32.xlu0 %v2655_v0 }
 0xdbb   : > { %v2657_v4 = vpop.xlane.xlu0 %2656 }
 0xdbc   : > { %v2658_v46 = vmul.f32 0.0625, %v2657_v4 }
 0xdbe   : > { %v2659_v55 = vadd.f32 1e-05, %v2658_v46  ;;  %v3092_v46 = vrot.slane %v3866_v45, %v4893_v33 }
 0xdc0   : > { %4479 = vrsqrt.f32 %v2659_v55 }
 0xdca   : > { %v4480_v7 = vpop.eup %4479 }
 0xdcb   : > { %v2661_v9 = vmul.f32 %v4480_v7, %v2653_v62  ;;  %v3873_v62 = vld [vmem:[%s5267_s19 + $0x18] sm:$0xff] }
 0xdcc   : > { %v4393_v63 = vpack.c.bf16 %v3873_v62, %v3872_v61 }
 0xdcd   : > { %v2666_v11 = vmul.f32 %v2665_v58, %v2661_v9  ;;  %v3877_v9 = vld [vmem:[%s5269_s21 + $0x8] sm:$0xff] }
 0xdcf   : > { %v2671_v12 = vadd.f32 %v2670_v8, %v2666_v11  ;;  %v3875_v11 = vld [vmem:[%s5268_s20 + $0x1] ss:$0 sm:$0xff] }
 0xdd1   : > { %v2672_v6 = vmax.f32 %v2671_v12, 0.0  ;;  %v3885_v12 = vld [vmem:[%s5265_s17 + $0x40] sm:$0xff] }
 0xdd3   : > { %4201 = vmatmul.mubr.msk.f32.vlgmr.msra.gmra.mrb[2].mxu1 %vm1237_vm8, %v2672_v6  ;;  %v3886_v6 = vld [vmem:[%s5265_s17 + $0x48] sm:$0xff] }
 0xdd4   : > { %4210 = vmatprep.mubr.msk.f32.mxu1 %vm4534_vm10, %v4535_v22  ;;  %4209 = vmatpush3.msk.msra.mxu1 %vm2843_vm12, %v2838_v5  ;;  %v4396_v10 = vpack.c.bf16 %v3886_v6, %v3885_v12 }
 0xdd5   : > { %4386 = vmatprep.subr.bf16.mxu1 %v4533_v50 }
 0xea6   : > { %v2751_v17 = vpop.f32.mrb[2].mxu1 }
 0xea7   : > { %v2752_v18 = vadd.f32 %v3859_v15, %v2751_v17  ;;  %v4202_v19 = vpop.f32.mrb[3].mxu1  ;;  %v3887_v17 = vld [vmem:[%s5265_s17 + $0x50] sm:$0xff] }
 0xea9   : > { %v2755_v31 = vmax.f32 %v2752_v18, 0.0  ;;  %v3888_v18 = vld [vmem:[%s5265_s17 + $0x58] sm:$0xff] }
 0xeaa   : > { %v4399_v19 = vpack.c.bf16 %v3888_v18, %v3887_v17 }
 0xeab   : > { %4206 = vmatmul.mubr.msk.f32.vlgmr.msra.gmra.mrb[4].mxu0 %vm2764_vm13, %v2755_v31  ;;  %v3879_v31 = vld [vmem:[%s5270_s22 + $0x1] ss:$0 sm:$0xff] }
 0xeac   : > { %4382 = vmatpush3.bf16.msra.mxu0 %v4381_v21  ;;  %4221 = vmatprep.mubr.msk.f32.mxu0 %vm4534_vm10, %v4535_v22  ;;  %v3881_v21 = vld [vmem:[%s5272_s24 + $0x4] sm:$0xf] }
 0xead   : > { %4383 = vmatprep.subr.bf16.mxu0 %v4533_v50 }
 0xeb0   : > { %4385 = vmatpush3.bf16.msra.mxu0 %v4384_v28 }
 0xeb1   : > { %4392 = vmatprep.subr.bf16.mxu0 %v4533_v50 }
 0xeb3   : > { %4222 = vmatmul.mubr.msk.f32.vlgmr.msra.gmra.mrb[6].mxu0 %vm1395_vm9, %v2561_v32 }
 0xeb4   : > { %4239 = vmatprep.mubr.msk.f32.mxu0 %vm4534_vm10, %v4535_v22  ;;  %4394 = vmatpush3.bf16.msra.mxu0 %v4393_v63 }
 0xeb5   : > { %4247 = vmatprep.subr.mxu0 %v4535_v22 }
 0xf7e   : > { %v2834_v27 = vpop.f32.mrb[4].mxu0 }
 0xf7f   : > { %v2835_v26 = vadd.f32 %v3861_v39, %v2834_v27  ;;  %v4207_v36 = vpop.f32.mrb[5].mxu0 }
 0xf81   : > { %4211 = vmatmul.mubr.msk.f32.vlgmr.msra.gmra.mrb[4].mxu1 %vm2839_vm14, %v2835_v26 }
 0xf82   : > { %4388 = vmatpush3.bf16.msra.mxu1 %v4387_v25  ;;  %4232 = vmatprep.mubr.msk.f32.mxu1 %vm4534_vm10, %v4535_v22 }
 0xf83   : > { %4389 = vmatprep.subr.bf16.mxu1 %v4533_v50 }
 0xf86   : > { %v2986_v41 = vpop.f32.mrb[6].mxu0  ;;  %4391 = vmatpush3.bf16.msra.mxu1 %v4390_v40  ;;  %v4402_v40 = vpack.c.bf16 %v3891_v38, %v3890_v37 }
 0xf87   : > { %v4223_v42 = vpop.f32.mrb[7].mxu0  ;;  %4242 = vmatprep.subr.mxu1 %v4535_v22 }
 0xf89   : > { %4233 = vmatmul.mubr.msk.f32.vlgmr.msra.gmra.mrb[6].mxu1 %vm1395_vm9, %v5033_v47 }
 0xf8a   : > { %4244 = vmatprep.mubr.msk.f32.mxu1 %vm4534_vm10, %v4535_v22  ;;  %4243 = vmatpush3.msra.mxu1 %v3877_v9 }
 0xf8b   : > { %4395 = vmatprep.subr.bf16.mxu1 %v4533_v50 }
0x1054   : > { %v2913_v43 = vpop.f32.mrb[4].mxu1 }
0x1055   : > { %v5120_v44 = vadd.f32 %v2986_v41, %v2913_v43  ;;  %v4212_v20 = vpop.f32.mrb[5].mxu1 }
0x105c   : > { %v3067_v49 = vpop.f32.mrb[6].mxu1 }
0x105d   : > { %v3068_v51 = vadd.f32 %v3067_v49, %v3000_v48  ;;  %v4234_v52 = vpop.f32.mrb[7].mxu1 }
0x105f   : > { %v3071_v53 = vsel %vm2647_vm11, %v3068_v51, 0.0 }
0x1060   : > { %3072 = vadd.xlane.f32.xlu1 %v3071_v53 }
0x10ed   : > { %v3073_v54 = vpop.xlane.xlu1 %3072 }
0x10ee   : > { %v3074_v56 = vmul.f32 0.0625, %v3073_v54 }
0x10f0   : > { %v3075_v57 = vsub.f32 %v3068_v51, %v3074_v56 }
0x10f2   : > { %v3076_v59 = vmul.f32 %v3075_v57, %v3075_v57 }
0x10f4   : > { %v3077_v60 = vsel %vm2647_vm11, %v3076_v59, 0.0  ;;  %v3899_v59 = vld [vmem:[%s5272_s24 + $0x8] sm:$0xf] }
0x10f5   : > { %3078 = vadd.xlane.f32.xlu1 %v3077_v60  ;;  %v3893_v60 = vld [vmem:[%s5268_s20 + $0x2] ss:$0 sm:$0xff] }
0x1182   : > { %v3079_v0 = vpop.xlane.xlu1 %3078 }
0x1183   : > { %v3080_v1 = vmul.f32 0.0625, %v3079_v0 }
0x1185   : > { %v3081_v2 = vadd.f32 1e-05, %v3080_v1 }
0x1187   : > { %4481 = vrsqrt.f32 %v3081_v2 }
0x1191   : > { %v4482_v4 = vpop.eup %4481 }
0x1192   : > { %v3083_v55 = vmul.f32 %v4482_v4, %v3075_v57  ;;  %v3694_v4 = vld [vmem:[%s5319_s27] sm:$0x7] }
0x1193   : > { %v3721_v18 = vrot.slane %v3694_v4, %v4893_v33 }
0x1194   : > { %v3088_v58 = vmul.f32 %v3087_v3, %v3083_v55 }
0x1196   : > { %v3093_v7 = vadd.f32 %v3092_v46, %v3088_v58  ;;  %v3698_v46 = vrot.slane %v3694_v4, %v4882_v13 }
0x1198   : > { %v3094_v8 = vmax.f32 %v3093_v7, 0.0 }
0x119a   : > { %4240 = vmatmul.mubr.msk.f32.vlgmr.msra.gmra.mrb[8].mxu0 %vm1237_vm8, %v3094_v8 }
0x119b   : > { %4249 = vmatprep.mubr.msk.f32.mxu0 %vm4534_vm10, %v4535_v22  ;;  %4248 = vmatpush3.msk.msra.mxu0 %vm2843_vm12, %v3881_v21 }
0x119c   : > { %4401 = vmatprep.subr.bf16.mxu0 %v4533_v50 }
0x126d   : > { %v3175_v14 = vpop.f32.mrb[8].mxu0 }
0x126e   : > { %v3176_v5 = vadd.f32 %v3875_v11, %v3175_v14  ;;  %v4241_v15 = vpop.f32.mrb[9].mxu0 }
0x1270   : > { %v3179_v16 = vmax.f32 %v3176_v5, 0.0 }
0x1272   : > { %4245 = vmatmul.mubr.msk.f32.vlgmr.msra.gmra.mrb[8].mxu1 %vm2764_vm13, %v3179_v16 }
0x1273   : > { %4397 = vmatpush3.bf16.msra.mxu1 %v4396_v10  ;;  %4260 = vmatprep.mubr.msk.f32.mxu1 %vm4534_vm10, %v4535_v22 }
0x1274   : > { %4398 = vmatprep.subr.bf16.mxu1 %v4533_v50 }
0x1277   : > { %4400 = vmatpush3.bf16.msra.mxu1 %v4399_v19 }
0x1278   : > { %4275 = vmatprep.subr.mxu1 %v4535_v22 }
0x127a   : > { %4261 = vmatmul.mubr.msk.f32.vlgmr.msra.gmra.mrb[10].mxu1 %vm1395_vm9, %v5033_v47  ;;  %v3884_v47 = vld [vmem:[%s5266_s18 + $0x8] sm:$0x7] }
0x127b   : > { %4277 = vmatprep.mubr.msk.f32.mxu1 %vm4534_vm10, %v4535_v22  ;;  %v3352_v30 = vrot.slane %v3884_v47, %v4882_v13  ;;  %v3439_v49 = vrot.slane %v3884_v47, %v4885_v29  ;;  %v3444_v52 = vrot.slane %v3884_v47, %v4893_v33  ;;  %4276 = vmatpush3.msk.msra.mxu1 %vm2843_vm12, %v3899_v59 }
0x127c   : > { %v3716_v13 = vrot.slane %v3694_v4, %v4885_v29 }
0x1345   : > { %v3259_v23 = vpop.f32.mrb[8].mxu1 }
0x1346   : > { %v3260_v24 = vadd.f32 %v3879_v31, %v3259_v23  ;;  %v4246_v28 = vpop.f32.mrb[9].mxu1 }
0x1348   : > { %4250 = vmatmul.mubr.msk.f32.vlgmr.msra.gmra.mrb[10].mxu0 %vm2839_vm14, %v3260_v24 }
0x1349   : > { %4267 = vmatprep.mubr.msk.f32.mxu0 %vm4534_vm10, %v4535_v22  ;;  %4403 = vmatpush3.bf16.msra.mxu0 %v4402_v40 }
0x134a   : > { %4270 = vmatprep.subr.mxu0 %v4535_v22 }
0x134d   : > { %v3419_v32 = vpop.f32.mrb[10].mxu1 }
0x134e   : > { %v3420_v50 = vadd.f32 %v3419_v32, %v3352_v30  ;;  %v4262_v34 = vpop.f32.mrb[11].mxu1 }
0x1350   : > { %v3423_v35 = vsel %vm2647_vm11, %v3420_v50, 0.0 }
0x1351   : > { %3424 = vadd.xlane.f32.xlu0 %v3423_v35 }
0x13de   : > { %v3425_v39 = vpop.xlane.xlu0 %3424 }
0x13df   : > { %v3426_v27 = vmul.f32 0.0625, %v3425_v39 }
0x13e1   : > { %v3427_v25 = vsub.f32 %v3420_v50, %v3426_v27 }
0x13e3   : > { %v3428_v26 = vmul.f32 %v3427_v25, %v3427_v25 }
0x13e5   : > { %v3429_v36 = vsel %vm2647_vm11, %v3428_v26, 0.0 }
0x13e6   : > { %3430 = vadd.xlane.f32.xlu1 %v3429_v36 }
0x141b   : > { %v3337_v41 = vpop.f32.mrb[10].mxu0 }
0x141c   : > { %v3341_v42 = vadd.f32 %v3337_v41, %v5120_v44  ;;  %v4251_v43 = vpop.f32.mrb[11].mxu0  ;;  %v3895_v44 = vld [vmem:[%s5269_s21 + $0x10] sm:$0xff] }
0x1473   : > { %v3431_v20 = vpop.xlane.xlu1 %3430 }
0x1474   : > { %v3432_v45 = vmul.f32 0.0625, %v3431_v20 }
0x1476   : > { %v3433_v48 = vadd.f32 1e-05, %v3432_v45 }
0x1478   : > { %4483 = vrsqrt.f32 %v3433_v48 }
0x1482   : > { %v4484_v51 = vpop.eup %4483 }
0x1483   : > { %v3435_v53 = vmul.f32 %v4484_v51, %v3427_v25 }
0x1485   : > { %v3440_v54 = vmul.f32 %v3439_v49, %v3435_v53 }
0x1487   : > { %v3445_v56 = vadd.f32 %v3444_v52, %v3440_v54 }
0x1489   : > { %v3446_v57 = vmax.f32 %v3445_v56, 0.0 }
0x148b   : > { %4268 = vmatmul.mubr.msk.f32.vlgmr.msra.gmra.mrb[12].mxu0 %vm1237_vm8, %v3446_v57 }
0x148c   : > { %4272 = vmatprep.mubr.msk.f32.mxu0 %vm4534_vm10, %v4535_v22  ;;  %4271 = vmatpush3.msra.mxu0 %v3895_v44  ;;  %v3897_v22 = vld [vmem:[%s5270_s22 + $0x2] ss:$0 sm:$0xff] }
0x155e   : > { %v3527_v61 = vpop.f32.mrb[12].mxu0 }
0x155f   : > { %v3528_v62 = vadd.f32 %v3893_v60, %v3527_v61  ;;  %v4269_v63 = vpop.f32.mrb[13].mxu0 }
0x1561   : > { %v3531_v0 = vmax.f32 %v3528_v62, 0.0 }
0x1563   : > { %4273 = vmatmul.mubr.msk.f32.vlgmr.msra.gmra.mrb[14].mxu0 %vm2764_vm13, %v3531_v0 }
0x1636   : > { %v3611_v1 = vpop.f32.mrb[14].mxu0 }
0x1637   : > { %v3612_v2 = vadd.f32 %v3897_v22, %v3611_v1  ;;  %v4274_v3 = vpop.f32.mrb[15].mxu0 }
0x1639   : > { %4278 = vmatmul.mubr.msk.f32.vlgmr.msra.gmra.mrb[12].mxu1 %vm2839_vm14, %v3612_v2 }
0x170c   : > { %v3689_v55 = vpop.f32.mrb[12].mxu1 }
0x170d   : > { %v3693_v58 = vadd.f32 %v3689_v55, %v3341_v42  ;;  %v4279_v7 = vpop.f32.mrb[13].mxu1 }
0x170f   : > { %v3699_v8 = vadd.f32 %v3698_v46, %v3693_v58 }
0x1711   : > { %v3700_v9 = vsel %vm2647_vm11, %v3699_v8, 0.0 }
0x1712   : > { %3701 = vadd.xlane.f32.xlu0 %v3700_v9 }
0x179f   : > { %v3702_v11 = vpop.xlane.xlu0 %3701 }
0x17a0   : > { %v3703_v12 = vmul.f32 0.0625, %v3702_v11 }
0x17a2   : > { %v3704_v6 = vsub.f32 %v3699_v8, %v3703_v12 }
0x17a4   : > { %v3705_v14 = vmul.f32 %v3704_v6, %v3704_v6 }
0x17a6   : > { %v3706_v5 = vsel %vm2647_vm11, %v3705_v14, 0.0 }
0x17a7   : > { %3707 = vadd.xlane.f32.xlu1 %v3706_v5 }
0x1834   : > { %v3708_v15 = vpop.xlane.xlu1 %3707 }
0x1835   : > { %v3709_v10 = vmul.f32 0.0625, %v3708_v15 }
0x1837   : > { %v3710_v16 = vadd.f32 1e-05, %v3709_v10 }
0x1839   : > { %4485 = vrsqrt.f32 %v3710_v16 }
0x1843   : > { %v4486_v17 = vpop.eup %4485 }
0x1844   : > { %v3712_v19 = vmul.f32 %v4486_v17, %v3704_v6 }
0x1846   : > { %v3717_v21 = vmul.f32 %v3716_v13, %v3712_v19 }
0x1848   : > { %v3722_v31 = vadd.f32 %v3721_v18, %v3717_v21 }
0x184a   : > { %v3723_v23 = vmax.f32 %v3722_v31, 0.0 }
0x184c   : > { %3724 = vst.msk [vmem:[#allocation3] sm:$0x3] %vm2647_vm11, %v3723_v23 }
0x184d PF: > { %p4421_p6 = scmp.eq.s32.totalorder %s4678_s3, 1  ;;  %s4536_s9 = smov [#allocation3]  }
0x184e   : > { %s3732_s10 = sshll.u32 %s4536_s9, 4  ;;  %s3733_s10 = int_to_ptr.vmem [resolvable:$true] %s3732_s10 }
0x184f   : > { %s4487_s6 = scalar_lea.vmem %s3733_s10, 32  ;;  %p4494_p10 = scmp.lt.s32.totalorder %s3733_s10, %s3733_s10 }
0x1850   : > { %p4488_p7 = scmp.ne.s32.totalorder %s3733_s10, %s4487_s6  ;;  %p4495_p11 = scmp.lt.s32.totalorder %s4487_s6, %s4487_s6 }
0x1852   : > { %p4489_p8 = pnand %p4488_p7, %p4421_p6  ;;  %p4496_p12 = por %p4495_p11, %p4494_p10 }
0x1854   : > { %p4490_p9 = pneg %p4489_p8 }
0x1856   : > { %p4497_p13 = pnand %p4496_p12, %p4490_p9 }
0x1858   : > { %4500 = shalt.err (!%p4497_p13)
}
0x1859   : > { %s5320_s30 = sld [smem:[#allocation22_spill]] }
0x185f   : > { %s4501_s7 = scalar_lea.hbm %s5320_s30, 32 }
0x1860   : > { %p4502_p0 = scmp.ne.s32.totalorder %s5320_s30, %s4501_s7  ;;  %p4507_p3 = scmp.lt.u32.totalorder %s4501_s7, %s5320_s30 }
0x1862   : > { %p4503_p1 = pnand %p4502_p0, %p4421_p6 }
0x1864   : > { %p4504_p2 = pneg %p4503_p1 }
0x1866   : > { %p4509_p4 = pnand %p4507_p3, %p4504_p2 }
0x1868   : > { %4512 = shalt.err (!%p4509_p4)
}
0x1869   : > { %4418 = dma.vmem_to_hbm [thread:$0]  (%p4421_p6), %s3733_s10, 32, %s5320_s30, [#allocation4]  }
0x186a   : > { %4518 = dma.done.wait (%p4421_p6), [#allocation4], 32  }
0x186b   : > { %4520 = vsyncadd (%p4421_p6), [#allocation4], 4294967264 }
0x186c PF: > { %s5321_s6 = sld [smem:[#allocation6_spill]] }
0x1872   : > { %s37_s27 = sadd.s32 1, %s5321_s6  }
0x1873   : > { %p34_p5 = scmp.ge.s32.totalorder %s37_s27, 4  }
0x1875   :  { %36 = sbr.rel (!%p34_p5) target bundleno = 18 (0x12), region = 182 }
0x187c   :  { %3745 = vsyncpa [#allocation4], 1 }
0x187d   :  { %3747 = vsyncpa [#allocation4 + $0x1], 1 }

</bundles_post_ra>
